<compile_context>
chip_gen: v5e
topology: v5e:2x2
jax: 0.10.0
libtpu: 0.0.40
codegen_flags: <defaults>
</compile_context>

<pallas_src>
import functools

import jax
import jax.numpy as jnp
from jax.experimental import pallas as pl
from jax.experimental.pallas import tpu as pltpu


def _zero_halo(pad_ref, H, W, C):
    """Zero only the 1-pixel halo frame of a lane-dense padded buffer.

    pad_ref: (H+2, (W+2)*C) float32.  The interior (rows 1..H, lanes
    C..(W+1)*C) is fully overwritten every grid step, so only the thin frame
    needs clearing — no full-buffer VPU zero-fill.
    """
    lanes = (W + 2) * C
    zrow = jnp.zeros((1, lanes), jnp.float32)
    zcol = jnp.zeros((H + 2, C), jnp.float32)
    pad_ref[0:1, :] = zrow                                   # top halo row
    pad_ref[H + 1:H + 2, :] = zrow                           # bottom halo row
    pad_ref[:, 0:C] = zcol                                   # left halo column
    pad_ref[:, (W + 1) * C:(W + 2) * C] = zcol               # right halo column


def _conv3x3_taps(pad_ref, w_ref, shift_ref, H, W, C):
    """3x3 conv (+ folded BN shift + ReLU) as 9 accumulating per-tap matmuls.

    pad_ref:   (H+2, (W+2)*C) f32  zero-framed, lane-dense padded activation
    w_ref:     (9, W*C, W*Co) bf16 per-tap W-block-diagonal weights (BN folded)
    shift_ref: (1, W*Co)      f32  folded conv-bias + BN shift (tiled per w)
    returns:   (H, W*Co) f32 activation (lane-dense)
    """
    acc = None
    for t in range(9):
        kh, kw = divmod(t, 3)
        # Contiguous lane slice: tap shift along kw is just a lane offset.
        patch = pad_ref[kh:kh + H, kw * C:kw * C + W * C].astype(jnp.bfloat16)
        part = jnp.dot(patch, w_ref[t], preferred_element_type=jnp.float32)
        acc = part if acc is None else acc + part
    return jnp.maximum(acc + shift_ref[...], 0.0)


def _unet_conv2_kernel(x_ref, w1_ref, shift1_ref, w2_ref, shift2_ref, out_ref,
                       pad1_ref, pad2_ref, *, H, W, Cin, Cmid, Cout):
    """Fused Conv3x3+BN+ReLU -> Conv3x3+BN+ReLU for one batch element.

    x_ref:      (1, H, W*Cin)  bf16 lane-dense input block
    w1_ref:     (9, W*Cin, W*Cmid)  bf16 block-diagonal per-tap weights
    shift1_ref: (1, W*Cmid)    f32
    w2_ref:     (9, W*Cmid, W*Cout) bf16
    shift2_ref: (1, W*Cout)    f32
    out_ref:    (1, H, W*Cout) f32 lane-dense output block
    pad1/pad2:  VMEM scratch, halo built in-kernel (no wrapper jnp.pad, no HBM
                round trip for the intermediate activation)
    """
    # ---- conv1 block ----
    _zero_halo(pad1_ref, H, W, Cin)
    pad1_ref[1:H + 1, Cin:(W + 1) * Cin] = x_ref[0].astype(jnp.float32)
    h1 = _conv3x3_taps(pad1_ref, w1_ref, shift1_ref, H, W, Cin)      # (H, W*Cmid)

    # ---- conv2 block: intermediate never touches HBM, no reshape/relayout ----
    _zero_halo(pad2_ref, H, W, Cmid)
    pad2_ref[1:H + 1, Cmid:(W + 1) * Cmid] = h1
    h2 = _conv3x3_taps(pad2_ref, w2_ref, shift2_ref, H, W, Cmid)     # (H, W*Cout)

    out_ref[0] = h2.astype(out_ref.dtype)


def fold_bn_make_blockdiag(w_oihw, conv_bias, gamma, beta, running_mean,
                           running_var, W, eps=1e-5):
    """Fold eval-mode BatchNorm2d (+conv bias) into per-tap block-diag weights.

    Returns:
      wbd:   (9, W*Cin, W*Cout) bf16 — tap t=(kh*3+kw); block-diagonal over the
             image width so a lane-dense (H, W*Cin) patch @ wbd[t] yields the
             lane-dense (H, W*Cout) contribution of that tap.
      shift: (1, W*Cout) f32 — beta + scale*(bias - mean), tiled per w.
    """
    scale = gamma / jnp.sqrt(running_var + eps)                  # (Cout,)
    w = jnp.transpose(w_oihw, (2, 3, 1, 0)) * scale              # (3,3,Cin,Cout)
    kh, kw, cin, cout = w.shape
    w9 = w.reshape(kh * kw, cin, cout)                           # (9,Cin,Cout)
    eye = jnp.eye(W, dtype=w.dtype)
    wbd = jnp.einsum("tio,wv->twivo", w9, eye).reshape(9, W * cin, W * cout)
    shift = beta + scale * (conv_bias - running_mean)            # (Cout,)
    shift_bd = jnp.tile(shift, W).reshape(1, W * cout)
    return wbd.astype(jnp.bfloat16), shift_bd.astype(jnp.float32)


def unet_conv2_forward(x_nchw, params):
    """Full UnetConv2 forward (single fused Pallas kernel). x_nchw: (N,Cin,H,W)."""
    N, Cin, H, W = x_nchw.shape
    # NCHW -> NHWC -> lane-dense (N, H, W*Cin); bf16 halves the input DMA.
    x = jnp.transpose(x_nchw, (0, 2, 3, 1)).reshape(N, H, W * Cin)
    x = x.astype(jnp.bfloat16)

    w1, shift1 = fold_bn_make_blockdiag(params["w1"], params["b1"], params["g1"],
                                        params["beta1"], params["mean1"],
                                        params["var1"], W)
    w2, shift2 = fold_bn_make_blockdiag(params["w2"], params["b2"], params["g2"],
                                        params["beta2"], params["mean2"],
                                        params["var2"], W)
    Cmid = params["w1"].shape[0]
    Cout = params["w2"].shape[0]

    kernel = functools.partial(_unet_conv2_kernel, H=H, W=W, Cin=Cin,
                               Cmid=Cmid, Cout=Cout)

    out = pl.pallas_call(
        kernel,
        out_shape=jax.ShapeDtypeStruct((N, H, W * Cout), jnp.float32),
        grid_spec=pltpu.PrefetchScalarGridSpec(
            num_scalar_prefetch=0,
            grid=(N,),
            in_specs=[
                pl.BlockSpec((1, H, W * Cin), lambda n: (n, 0, 0)),
                pl.BlockSpec((9, W * Cin, W * Cmid), lambda n: (0, 0, 0)),
                pl.BlockSpec((1, W * Cmid), lambda n: (0, 0)),
                pl.BlockSpec((9, W * Cmid, W * Cout), lambda n: (0, 0, 0)),
                pl.BlockSpec((1, W * Cout), lambda n: (0, 0)),
            ],
            out_specs=pl.BlockSpec((1, H, W * Cout), lambda n: (n, 0, 0)),
            scratch_shapes=[
                pltpu.VMEM((H + 2, (W + 2) * Cin), jnp.float32),   # padded conv1 input
                pltpu.VMEM((H + 2, (W + 2) * Cmid), jnp.float32),  # padded conv2 input
            ],
        ),
        compiler_params=pltpu.CompilerParams(
            dimension_semantics=("parallel",)),
    )(x, w1, shift1, w2, shift2)

    out = out.reshape(N, H, W, Cout)
    return jnp.transpose(out, (0, 3, 1, 2))  # back to NCHW


def reference_forward(x_nchw, params):
    """Pure-JAX reference (lax conv, f32) for correctness check."""
    def block(x, w, b, g, beta, mean, var):
        y = jax.lax.conv_general_dilated(
            x, w, window_strides=(1, 1), padding=((1, 1), (1, 1)),
            dimension_numbers=("NCHW", "OIHW", "NCHW"))
        y = y + b[None, :, None, None]
        y = (y - mean[None, :, None, None]) / jnp.sqrt(var[None, :, None, None] + 1e-5)
        y = y * g[None, :, None, None] + beta[None, :, None, None]
        return jnp.maximum(y, 0.0)

    h = block(x_nchw, params["w1"], params["b1"], params["g1"],
              params["beta1"], params["mean1"], params["var1"])
    return block(h, params["w2"], params["b2"], params["g2"],
                 params["beta2"], params["mean2"], params["var2"])


def init_params(key, in_size, out_size):
    ks = jax.random.split(key, 10)
    p = {}
    p["w1"] = 0.1 * jax.random.normal(ks[0], (out_size, in_size, 3, 3), jnp.float32)
    p["b1"] = 0.05 * jax.random.normal(ks[1], (out_size,), jnp.float32)
    p["w2"] = 0.1 * jax.random.normal(ks[2], (out_size, out_size, 3, 3), jnp.float32)
    p["b2"] = 0.05 * jax.random.normal(ks[3], (out_size,), jnp.float32)
    p["g1"] = 1.0 + 0.1 * jax.random.normal(ks[4], (out_size,), jnp.float32)
    p["beta1"] = 0.05 * jax.random.normal(ks[5], (out_size,), jnp.float32)
    p["mean1"] = 0.02 * jax.random.normal(ks[6], (out_size,), jnp.float32)
    p["var1"] = jax.random.uniform(ks[7], (out_size,), jnp.float32, 0.5, 1.5)
    p["g2"] = 1.0 + 0.1 * jax.random.normal(ks[8], (out_size,), jnp.float32)
    p["beta2"] = 0.05 * jax.random.normal(ks[9], (out_size,), jnp.float32)
    p["mean2"] = jnp.zeros((out_size,), jnp.float32)
    p["var2"] = jnp.ones((out_size,), jnp.float32)
    return p


if __name__ == "__main__":
    # TODO(synk): BatchNorm is implemented in eval (running-stats) mode; PyTorch
    # train-mode batch statistics are not reproduced.
    N, Cin, Cout, H, W = 2, 4, 8, 16, 16
    key = jax.random.PRNGKey(0)
    kx, kp = jax.random.split(key)
    x = jax.random.normal(kx, (N, Cin, H, W), jnp.float32)
    params = init_params(kp, Cin, Cout)

    out = jax.block_until_ready(unet_conv2_forward(x, params))
    ref = jax.block_until_ready(reference_forward(x, params))

    assert out.shape == (N, Cout, H, W)
    # bf16 matmul operands (f32 accumulation/epilogue) -> loosened tolerance.
    assert jnp.allclose(out, ref, rtol=2e-2, atol=5e-2), "mismatch vs reference"

    print("KERNEL_OK")
</pallas_src>

<mosaic_0001>
module attributes {stable_mosaic.version = 11 : i64} {
  func.func @_unet_conv2_kernel(%arg0: i32, %arg1: memref<1x16x64xbf16, #tpu.memory_space<vmem>>, %arg2: memref<9x64x128xbf16, #tpu.memory_space<vmem>>, %arg3: memref<1x128xf32, #tpu.memory_space<vmem>>, %arg4: memref<9x128x128xbf16, #tpu.memory_space<vmem>>, %arg5: memref<1x128xf32, #tpu.memory_space<vmem>>, %arg6: memref<1x16x128xf32, #tpu.memory_space<vmem>>, %arg7: memref<18x72xf32, #tpu.memory_space<vmem>>, %arg8: memref<18x144xf32, #tpu.memory_space<vmem>>) attributes {dimension_semantics = [#tpu.dimension_semantics<parallel>], iteration_bounds = array<i64: 2>, scalar_prefetch = 0 : i64, scratch_operands = 2 : i64, tpu.core_type = #tpu.core_type<tc>, window_params = [{transform_indices = @transform_0, window_bounds = array<i64: 1, 16, 64>}, {pipeline_mode = #tpu.pipeline_mode<synchronous>, transform_indices = @transform_1, window_bounds = array<i64: 9, 64, 128>}, {pipeline_mode = #tpu.pipeline_mode<synchronous>, transform_indices = @transform_2, window_bounds = array<i64: 1, 128>}, {pipeline_mode = #tpu.pipeline_mode<synchronous>, transform_indices = @transform_3, window_bounds = array<i64: 9, 128, 128>}, {pipeline_mode = #tpu.pipeline_mode<synchronous>, transform_indices = @transform_4, window_bounds = array<i64: 1, 128>}, {transform_indices = @transform_5, window_bounds = array<i64: 1, 16, 128>}]} {
    %cst = arith.constant 0.000000e+00 : f32
    %0 = vector.broadcast %cst : f32 to vector<1x72xf32>
    %cst_0 = arith.constant 0.000000e+00 : f32
    %1 = vector.broadcast %cst_0 : f32 to vector<18x4xf32>
    %c0 = arith.constant 0 : index
    %c0_1 = arith.constant 0 : index
    %2 = vector.load %arg7[%c0, %c0_1] : memref<18x72xf32, #tpu.memory_space<vmem>>, vector<1x72xf32>
    tpu.vector_store %arg7[%c0, %c0_1], %0 {strides = array<i32>} : memref<18x72xf32, #tpu.memory_space<vmem>>, vector<1x72xf32>,
    %c17 = arith.constant 17 : index
    %c0_2 = arith.constant 0 : index
    %3 = vector.load %arg7[%c17, %c0_2] : memref<18x72xf32, #tpu.memory_space<vmem>>, vector<1x72xf32>
    tpu.vector_store %arg7[%c17, %c0_2], %0 {strides = array<i32>} : memref<18x72xf32, #tpu.memory_space<vmem>>, vector<1x72xf32>,
    %c0_3 = arith.constant 0 : index
    %c0_4 = arith.constant 0 : index
    %4 = vector.load %arg7[%c0_3, %c0_4] : memref<18x72xf32, #tpu.memory_space<vmem>>, vector<18x4xf32>
    tpu.vector_store %arg7[%c0_3, %c0_4], %1 {strides = array<i32>} : memref<18x72xf32, #tpu.memory_space<vmem>>, vector<18x4xf32>,
    %c0_5 = arith.constant 0 : index
    %c68 = arith.constant 68 : index
    %5 = vector.load %arg7[%c0_5, %c68] : memref<18x72xf32, #tpu.memory_space<vmem>>, vector<18x4xf32>
    tpu.vector_store %arg7[%c0_5, %c68], %1 {strides = array<i32>} : memref<18x72xf32, #tpu.memory_space<vmem>>, vector<18x4xf32>,
    %c0_6 = arith.constant 0 : index
    %c0_7 = arith.constant 0 : index
    %c0_8 = arith.constant 0 : index
    %6 = vector.load %arg1[%c0_6, %c0_7, %c0_8] : memref<1x16x64xbf16, #tpu.memory_space<vmem>>, vector<1x16x64xbf16>
    %7 = vector.shape_cast %6 : vector<1x16x64xbf16> to vector<16x64xbf16>
    %8 = arith.extf %7 : vector<16x64xbf16> to vector<16x64xf32>
    %c1 = arith.constant 1 : index
    %c4 = arith.constant 4 : index
    %9 = vector.load %arg7[%c1, %c4] : memref<18x72xf32, #tpu.memory_space<vmem>>, vector<16x64xf32>
    tpu.vector_store %arg7[%c1, %c4], %8 {strides = array<i32>} : memref<18x72xf32, #tpu.memory_space<vmem>>, vector<16x64xf32>,
    %c0_9 = arith.constant 0 : index
    %c0_10 = arith.constant 0 : index
    %10 = vector.load %arg7[%c0_9, %c0_10] : memref<18x72xf32, #tpu.memory_space<vmem>>, vector<16x64xf32>
    %11 = arith.truncf %10 : vector<16x64xf32> to vector<16x64xbf16>
    %c0_11 = arith.constant 0 : index
    %c0_12 = arith.constant 0 : index
    %c0_13 = arith.constant 0 : index
    %12 = vector.load %arg2[%c0_11, %c0_12, %c0_13] : memref<9x64x128xbf16, #tpu.memory_space<vmem>>, vector<1x64x128xbf16>
    %13 = vector.shape_cast %12 : vector<1x64x128xbf16> to vector<64x128xbf16>
    %cst_14 = arith.constant dense<0.000000e+00> : vector<16x128xf32>
    %14 = tpu.matmul %11, %13, %cst_14 {dimension_numbers = #tpu.dot_dimension_numbers<[1], [0], [0], [1], [0, 0, 1, 1], [], []>} : vector<16x64xbf16>, vector<64x128xbf16>, vector<16x128xf32> -> vector<16x128xf32>
    %c0_15 = arith.constant 0 : index
    %c4_16 = arith.constant 4 : index
    %15 = vector.load %arg7[%c0_15, %c4_16] : memref<18x72xf32, #tpu.memory_space<vmem>>, vector<16x64xf32>
    %16 = arith.truncf %15 : vector<16x64xf32> to vector<16x64xbf16>
    %c1_17 = arith.constant 1 : index
    %c0_18 = arith.constant 0 : index
    %c0_19 = arith.constant 0 : index
    %17 = vector.load %arg2[%c1_17, %c0_18, %c0_19] : memref<9x64x128xbf16, #tpu.memory_space<vmem>>, vector<1x64x128xbf16>
    %18 = vector.shape_cast %17 : vector<1x64x128xbf16> to vector<64x128xbf16>
    %cst_20 = arith.constant dense<0.000000e+00> : vector<16x128xf32>
    %19 = tpu.matmul %16, %18, %cst_20 {dimension_numbers = #tpu.dot_dimension_numbers<[1], [0], [0], [1], [0, 0, 1, 1], [], []>} : vector<16x64xbf16>, vector<64x128xbf16>, vector<16x128xf32> -> vector<16x128xf32>
    %20 = arith.addf %14, %19 : vector<16x128xf32>
    %c0_21 = arith.constant 0 : index
    %c8 = arith.constant 8 : index
    %21 = vector.load %arg7[%c0_21, %c8] : memref<18x72xf32, #tpu.memory_space<vmem>>, vector<16x64xf32>
    %22 = arith.truncf %21 : vector<16x64xf32> to vector<16x64xbf16>
    %c2 = arith.constant 2 : index
    %c0_22 = arith.constant 0 : index
    %c0_23 = arith.constant 0 : index
    %23 = vector.load %arg2[%c2, %c0_22, %c0_23] : memref<9x64x128xbf16, #tpu.memory_space<vmem>>, vector<1x64x128xbf16>
    %24 = vector.shape_cast %23 : vector<1x64x128xbf16> to vector<64x128xbf16>
    %cst_24 = arith.constant dense<0.000000e+00> : vector<16x128xf32>
    %25 = tpu.matmul %22, %24, %cst_24 {dimension_numbers = #tpu.dot_dimension_numbers<[1], [0], [0], [1], [0, 0, 1, 1], [], []>} : vector<16x64xbf16>, vector<64x128xbf16>, vector<16x128xf32> -> vector<16x128xf32>
    %26 = arith.addf %20, %25 : vector<16x128xf32>
    %c1_25 = arith.constant 1 : index
    %c0_26 = arith.constant 0 : index
    %27 = vector.load %arg7[%c1_25, %c0_26] : memref<18x72xf32, #tpu.memory_space<vmem>>, vector<16x64xf32>
    %28 = arith.truncf %27 : vector<16x64xf32> to vector<16x64xbf16>
    %c3 = arith.constant 3 : index
    %c0_27 = arith.constant 0 : index
    %c0_28 = arith.constant 0 : index
    %29 = vector.load %arg2[%c3, %c0_27, %c0_28] : memref<9x64x128xbf16, #tpu.memory_space<vmem>>, vector<1x64x128xbf16>
    %30 = vector.shape_cast %29 : vector<1x64x128xbf16> to vector<64x128xbf16>
    %cst_29 = arith.constant dense<0.000000e+00> : vector<16x128xf32>
    %31 = tpu.matmul %28, %30, %cst_29 {dimension_numbers = #tpu.dot_dimension_numbers<[1], [0], [0], [1], [0, 0, 1, 1], [], []>} : vector<16x64xbf16>, vector<64x128xbf16>, vector<16x128xf32> -> vector<16x128xf32>
    %32 = arith.addf %26, %31 : vector<16x128xf32>
    %c1_30 = arith.constant 1 : index
    %c4_31 = arith.constant 4 : index
    %33 = vector.load %arg7[%c1_30, %c4_31] : memref<18x72xf32, #tpu.memory_space<vmem>>, vector<16x64xf32>
    %34 = arith.truncf %33 : vector<16x64xf32> to vector<16x64xbf16>
    %c4_32 = arith.constant 4 : index
    %c0_33 = arith.constant 0 : index
    %c0_34 = arith.constant 0 : index
    %35 = vector.load %arg2[%c4_32, %c0_33, %c0_34] : memref<9x64x128xbf16, #tpu.memory_space<vmem>>, vector<1x64x128xbf16>
    %36 = vector.shape_cast %35 : vector<1x64x128xbf16> to vector<64x128xbf16>
    %cst_35 = arith.constant dense<0.000000e+00> : vector<16x128xf32>
    %37 = tpu.matmul %34, %36, %cst_35 {dimension_numbers = #tpu.dot_dimension_numbers<[1], [0], [0], [1], [0, 0, 1, 1], [], []>} : vector<16x64xbf16>, vector<64x128xbf16>, vector<16x128xf32> -> vector<16x128xf32>
    %38 = arith.addf %32, %37 : vector<16x128xf32>
    %c1_36 = arith.constant 1 : index
    %c8_37 = arith.constant 8 : index
    %39 = vector.load %arg7[%c1_36, %c8_37] : memref<18x72xf32, #tpu.memory_space<vmem>>, vector<16x64xf32>
    %40 = arith.truncf %39 : vector<16x64xf32> to vector<16x64xbf16>
    %c5 = arith.constant 5 : index
    %c0_38 = arith.constant 0 : index
    %c0_39 = arith.constant 0 : index
    %41 = vector.load %arg2[%c5, %c0_38, %c0_39] : memref<9x64x128xbf16, #tpu.memory_space<vmem>>, vector<1x64x128xbf16>
    %42 = vector.shape_cast %41 : vector<1x64x128xbf16> to vector<64x128xbf16>
    %cst_40 = arith.constant dense<0.000000e+00> : vector<16x128xf32>
    %43 = tpu.matmul %40, %42, %cst_40 {dimension_numbers = #tpu.dot_dimension_numbers<[1], [0], [0], [1], [0, 0, 1, 1], [], []>} : vector<16x64xbf16>, vector<64x128xbf16>, vector<16x128xf32> -> vector<16x128xf32>
    %44 = arith.addf %38, %43 : vector<16x128xf32>
    %c2_41 = arith.constant 2 : index
    %c0_42 = arith.constant 0 : index
    %45 = vector.load %arg7[%c2_41, %c0_42] : memref<18x72xf32, #tpu.memory_space<vmem>>, vector<16x64xf32>
    %46 = arith.truncf %45 : vector<16x64xf32> to vector<16x64xbf16>
    %c6 = arith.constant 6 : index
    %c0_43 = arith.constant 0 : index
    %c0_44 = arith.constant 0 : index
    %47 = vector.load %arg2[%c6, %c0_43, %c0_44] : memref<9x64x128xbf16, #tpu.memory_space<vmem>>, vector<1x64x128xbf16>
    %48 = vector.shape_cast %47 : vector<1x64x128xbf16> to vector<64x128xbf16>
    %cst_45 = arith.constant dense<0.000000e+00> : vector<16x128xf32>
    %49 = tpu.matmul %46, %48, %cst_45 {dimension_numbers = #tpu.dot_dimension_numbers<[1], [0], [0], [1], [0, 0, 1, 1], [], []>} : vector<16x64xbf16>, vector<64x128xbf16>, vector<16x128xf32> -> vector<16x128xf32>
    %50 = arith.addf %44, %49 : vector<16x128xf32>
    %c2_46 = arith.constant 2 : index
    %c4_47 = arith.constant 4 : index
    %51 = vector.load %arg7[%c2_46, %c4_47] : memref<18x72xf32, #tpu.memory_space<vmem>>, vector<16x64xf32>
    %52 = arith.truncf %51 : vector<16x64xf32> to vector<16x64xbf16>
    %c7 = arith.constant 7 : index
    %c0_48 = arith.constant 0 : index
    %c0_49 = arith.constant 0 : index
    %53 = vector.load %arg2[%c7, %c0_48, %c0_49] : memref<9x64x128xbf16, #tpu.memory_space<vmem>>, vector<1x64x128xbf16>
    %54 = vector.shape_cast %53 : vector<1x64x128xbf16> to vector<64x128xbf16>
    %cst_50 = arith.constant dense<0.000000e+00> : vector<16x128xf32>
    %55 = tpu.matmul %52, %54, %cst_50 {dimension_numbers = #tpu.dot_dimension_numbers<[1], [0], [0], [1], [0, 0, 1, 1], [], []>} : vector<16x64xbf16>, vector<64x128xbf16>, vector<16x128xf32> -> vector<16x128xf32>
    %56 = arith.addf %50, %55 : vector<16x128xf32>
    %c2_51 = arith.constant 2 : index
    %c8_52 = arith.constant 8 : index
    %57 = vector.load %arg7[%c2_51, %c8_52] : memref<18x72xf32, #tpu.memory_space<vmem>>, vector<16x64xf32>
    %58 = arith.truncf %57 : vector<16x64xf32> to vector<16x64xbf16>
    %c8_53 = arith.constant 8 : index
    %c0_54 = arith.constant 0 : index
    %c0_55 = arith.constant 0 : index
    %59 = vector.load %arg2[%c8_53, %c0_54, %c0_55] : memref<9x64x128xbf16, #tpu.memory_space<vmem>>, vector<1x64x128xbf16>
    %60 = vector.shape_cast %59 : vector<1x64x128xbf16> to vector<64x128xbf16>
    %cst_56 = arith.constant dense<0.000000e+00> : vector<16x128xf32>
    %61 = tpu.matmul %58, %60, %cst_56 {dimension_numbers = #tpu.dot_dimension_numbers<[1], [0], [0], [1], [0, 0, 1, 1], [], []>} : vector<16x64xbf16>, vector<64x128xbf16>, vector<16x128xf32> -> vector<16x128xf32>
    %62 = arith.addf %56, %61 : vector<16x128xf32>
    %c0_57 = arith.constant 0 : index
    %c0_58 = arith.constant 0 : index
    %63 = vector.load %arg3[%c0_57, %c0_58] : memref<1x128xf32, #tpu.memory_space<vmem>>, vector<1x128xf32>
    %64 = vector.broadcast %63 : vector<1x128xf32> to vector<16x128xf32>
    %65 = arith.addf %62, %64 : vector<16x128xf32>
    %cst_59 = arith.constant 0.000000e+00 : f32
    %66 = vector.broadcast %cst_59 : f32 to vector<16x128xf32>
    %67 = arith.maximumf %65, %66 : vector<16x128xf32>
    %cst_60 = arith.constant 0.000000e+00 : f32
    %68 = vector.broadcast %cst_60 : f32 to vector<1x144xf32>
    %cst_61 = arith.constant 0.000000e+00 : f32
    %69 = vector.broadcast %cst_61 : f32 to vector<18x8xf32>
    %c0_62 = arith.constant 0 : index
    %c0_63 = arith.constant 0 : index
    %70 = vector.load %arg8[%c0_62, %c0_63] : memref<18x144xf32, #tpu.memory_space<vmem>>, vector<1x144xf32>
    tpu.vector_store %arg8[%c0_62, %c0_63], %68 {strides = array<i32>} : memref<18x144xf32, #tpu.memory_space<vmem>>, vector<1x144xf32>,
    %c17_64 = arith.constant 17 : index
    %c0_65 = arith.constant 0 : index
    %71 = vector.load %arg8[%c17_64, %c0_65] : memref<18x144xf32, #tpu.memory_space<vmem>>, vector<1x144xf32>
    tpu.vector_store %arg8[%c17_64, %c0_65], %68 {strides = array<i32>} : memref<18x144xf32, #tpu.memory_space<vmem>>, vector<1x144xf32>,
    %c0_66 = arith.constant 0 : index
    %c0_67 = arith.constant 0 : index
    %72 = vector.load %arg8[%c0_66, %c0_67] : memref<18x144xf32, #tpu.memory_space<vmem>>, vector<18x8xf32>
    tpu.vector_store %arg8[%c0_66, %c0_67], %69 {strides = array<i32>} : memref<18x144xf32, #tpu.memory_space<vmem>>, vector<18x8xf32>,
    %c0_68 = arith.constant 0 : index
    %c136 = arith.constant 136 : index
    %73 = vector.load %arg8[%c0_68, %c136] : memref<18x144xf32, #tpu.memory_space<vmem>>, vector<18x8xf32>
    tpu.vector_store %arg8[%c0_68, %c136], %69 {strides = array<i32>} : memref<18x144xf32, #tpu.memory_space<vmem>>, vector<18x8xf32>,
    %c1_69 = arith.constant 1 : index
    %c8_70 = arith.constant 8 : index
    %74 = vector.load %arg8[%c1_69, %c8_70] : memref<18x144xf32, #tpu.memory_space<vmem>>, vector<16x128xf32>
    tpu.vector_store %arg8[%c1_69, %c8_70], %67 {strides = array<i32>} : memref<18x144xf32, #tpu.memory_space<vmem>>, vector<16x128xf32>,
    %c0_71 = arith.constant 0 : index
    %c0_72 = arith.constant 0 : index
    %75 = vector.load %arg8[%c0_71, %c0_72] : memref<18x144xf32, #tpu.memory_space<vmem>>, vector<16x128xf32>
    %76 = arith.truncf %75 : vector<16x128xf32> to vector<16x128xbf16>
    %c0_73 = arith.constant 0 : index
    %c0_74 = arith.constant 0 : index
    %c0_75 = arith.constant 0 : index
    %77 = vector.load %arg4[%c0_73, %c0_74, %c0_75] : memref<9x128x128xbf16, #tpu.memory_space<vmem>>, vector<1x128x128xbf16>
    %78 = vector.shape_cast %77 : vector<1x128x128xbf16> to vector<128x128xbf16>
    %cst_76 = arith.constant dense<0.000000e+00> : vector<16x128xf32>
    %79 = tpu.matmul %76, %78, %cst_76 {dimension_numbers = #tpu.dot_dimension_numbers<[1], [0], [0], [1], [0, 0, 1, 1], [], []>} : vector<16x128xbf16>, vector<128x128xbf16>, vector<16x128xf32> -> vector<16x128xf32>
    %c0_77 = arith.constant 0 : index
    %c8_78 = arith.constant 8 : index
    %80 = vector.load %arg8[%c0_77, %c8_78] : memref<18x144xf32, #tpu.memory_space<vmem>>, vector<16x128xf32>
    %81 = arith.truncf %80 : vector<16x128xf32> to vector<16x128xbf16>
    %c1_79 = arith.constant 1 : index
    %c0_80 = arith.constant 0 : index
    %c0_81 = arith.constant 0 : index
    %82 = vector.load %arg4[%c1_79, %c0_80, %c0_81] : memref<9x128x128xbf16, #tpu.memory_space<vmem>>, vector<1x128x128xbf16>
    %83 = vector.shape_cast %82 : vector<1x128x128xbf16> to vector<128x128xbf16>
    %cst_82 = arith.constant dense<0.000000e+00> : vector<16x128xf32>
    %84 = tpu.matmul %81, %83, %cst_82 {dimension_numbers = #tpu.dot_dimension_numbers<[1], [0], [0], [1], [0, 0, 1, 1], [], []>} : vector<16x128xbf16>, vector<128x128xbf16>, vector<16x128xf32> -> vector<16x128xf32>
    %85 = arith.addf %79, %84 : vector<16x128xf32>
    %c0_83 = arith.constant 0 : index
    %c16 = arith.constant 16 : index
    %86 = vector.load %arg8[%c0_83, %c16] : memref<18x144xf32, #tpu.memory_space<vmem>>, vector<16x128xf32>
    %87 = arith.truncf %86 : vector<16x128xf32> to vector<16x128xbf16>
    %c2_84 = arith.constant 2 : index
    %c0_85 = arith.constant 0 : index
    %c0_86 = arith.constant 0 : index
    %88 = vector.load %arg4[%c2_84, %c0_85, %c0_86] : memref<9x128x128xbf16, #tpu.memory_space<vmem>>, vector<1x128x128xbf16>
    %89 = vector.shape_cast %88 : vector<1x128x128xbf16> to vector<128x128xbf16>
    %cst_87 = arith.constant dense<0.000000e+00> : vector<16x128xf32>
    %90 = tpu.matmul %87, %89, %cst_87 {dimension_numbers = #tpu.dot_dimension_numbers<[1], [0], [0], [1], [0, 0, 1, 1], [], []>} : vector<16x128xbf16>, vector<128x128xbf16>, vector<16x128xf32> -> vector<16x128xf32>
    %91 = arith.addf %85, %90 : vector<16x128xf32>
    %c1_88 = arith.constant 1 : index
    %c0_89 = arith.constant 0 : index
    %92 = vector.load %arg8[%c1_88, %c0_89] : memref<18x144xf32, #tpu.memory_space<vmem>>, vector<16x128xf32>
    %93 = arith.truncf %92 : vector<16x128xf32> to vector<16x128xbf16>
    %c3_90 = arith.constant 3 : index
    %c0_91 = arith.constant 0 : index
    %c0_92 = arith.constant 0 : index
    %94 = vector.load %arg4[%c3_90, %c0_91, %c0_92] : memref<9x128x128xbf16, #tpu.memory_space<vmem>>, vector<1x128x128xbf16>
    %95 = vector.shape_cast %94 : vector<1x128x128xbf16> to vector<128x128xbf16>
    %cst_93 = arith.constant dense<0.000000e+00> : vector<16x128xf32>
    %96 = tpu.matmul %93, %95, %cst_93 {dimension_numbers = #tpu.dot_dimension_numbers<[1], [0], [0], [1], [0, 0, 1, 1], [], []>} : vector<16x128xbf16>, vector<128x128xbf16>, vector<16x128xf32> -> vector<16x128xf32>
    %97 = arith.addf %91, %96 : vector<16x128xf32>
    %c1_94 = arith.constant 1 : index
    %c8_95 = arith.constant 8 : index
    %98 = vector.load %arg8[%c1_94, %c8_95] : memref<18x144xf32, #tpu.memory_space<vmem>>, vector<16x128xf32>
    %99 = arith.truncf %98 : vector<16x128xf32> to vector<16x128xbf16>
    %c4_96 = arith.constant 4 : index
    %c0_97 = arith.constant 0 : index
    %c0_98 = arith.constant 0 : index
    %100 = vector.load %arg4[%c4_96, %c0_97, %c0_98] : memref<9x128x128xbf16, #tpu.memory_space<vmem>>, vector<1x128x128xbf16>
    %101 = vector.shape_cast %100 : vector<1x128x128xbf16> to vector<128x128xbf16>
    %cst_99 = arith.constant dense<0.000000e+00> : vector<16x128xf32>
    %102 = tpu.matmul %99, %101, %cst_99 {dimension_numbers = #tpu.dot_dimension_numbers<[1], [0], [0], [1], [0, 0, 1, 1], [], []>} : vector<16x128xbf16>, vector<128x128xbf16>, vector<16x128xf32> -> vector<16x128xf32>
    %103 = arith.addf %97, %102 : vector<16x128xf32>
    %c1_100 = arith.constant 1 : index
    %c16_101 = arith.constant 16 : index
    %104 = vector.load %arg8[%c1_100, %c16_101] : memref<18x144xf32, #tpu.memory_space<vmem>>, vector<16x128xf32>
    %105 = arith.truncf %104 : vector<16x128xf32> to vector<16x128xbf16>
    %c5_102 = arith.constant 5 : index
    %c0_103 = arith.constant 0 : index
    %c0_104 = arith.constant 0 : index
    %106 = vector.load %arg4[%c5_102, %c0_103, %c0_104] : memref<9x128x128xbf16, #tpu.memory_space<vmem>>, vector<1x128x128xbf16>
    %107 = vector.shape_cast %106 : vector<1x128x128xbf16> to vector<128x128xbf16>
    %cst_105 = arith.constant dense<0.000000e+00> : vector<16x128xf32>
    %108 = tpu.matmul %105, %107, %cst_105 {dimension_numbers = #tpu.dot_dimension_numbers<[1], [0], [0], [1], [0, 0, 1, 1], [], []>} : vector<16x128xbf16>, vector<128x128xbf16>, vector<16x128xf32> -> vector<16x128xf32>
    %109 = arith.addf %103, %108 : vector<16x128xf32>
    %c2_106 = arith.constant 2 : index
    %c0_107 = arith.constant 0 : index
    %110 = vector.load %arg8[%c2_106, %c0_107] : memref<18x144xf32, #tpu.memory_space<vmem>>, vector<16x128xf32>
    %111 = arith.truncf %110 : vector<16x128xf32> to vector<16x128xbf16>
    %c6_108 = arith.constant 6 : index
    %c0_109 = arith.constant 0 : index
    %c0_110 = arith.constant 0 : index
    %112 = vector.load %arg4[%c6_108, %c0_109, %c0_110] : memref<9x128x128xbf16, #tpu.memory_space<vmem>>, vector<1x128x128xbf16>
    %113 = vector.shape_cast %112 : vector<1x128x128xbf16> to vector<128x128xbf16>
    %cst_111 = arith.constant dense<0.000000e+00> : vector<16x128xf32>
    %114 = tpu.matmul %111, %113, %cst_111 {dimension_numbers = #tpu.dot_dimension_numbers<[1], [0], [0], [1], [0, 0, 1, 1], [], []>} : vector<16x128xbf16>, vector<128x128xbf16>, vector<16x128xf32> -> vector<16x128xf32>
    %115 = arith.addf %109, %114 : vector<16x128xf32>
    %c2_112 = arith.constant 2 : index
    %c8_113 = arith.constant 8 : index
    %116 = vector.load %arg8[%c2_112, %c8_113] : memref<18x144xf32, #tpu.memory_space<vmem>>, vector<16x128xf32>
    %117 = arith.truncf %116 : vector<16x128xf32> to vector<16x128xbf16>
    %c7_114 = arith.constant 7 : index
    %c0_115 = arith.constant 0 : index
    %c0_116 = arith.constant 0 : index
    %118 = vector.load %arg4[%c7_114, %c0_115, %c0_116] : memref<9x128x128xbf16, #tpu.memory_space<vmem>>, vector<1x128x128xbf16>
    %119 = vector.shape_cast %118 : vector<1x128x128xbf16> to vector<128x128xbf16>
    %cst_117 = arith.constant dense<0.000000e+00> : vector<16x128xf32>
    %120 = tpu.matmul %117, %119, %cst_117 {dimension_numbers = #tpu.dot_dimension_numbers<[1], [0], [0], [1], [0, 0, 1, 1], [], []>} : vector<16x128xbf16>, vector<128x128xbf16>, vector<16x128xf32> -> vector<16x128xf32>
    %121 = arith.addf %115, %120 : vector<16x128xf32>
    %c2_118 = arith.constant 2 : index
    %c16_119 = arith.constant 16 : index
    %122 = vector.load %arg8[%c2_118, %c16_119] : memref<18x144xf32, #tpu.memory_space<vmem>>, vector<16x128xf32>
    %123 = arith.truncf %122 : vector<16x128xf32> to vector<16x128xbf16>
    %c8_120 = arith.constant 8 : index
    %c0_121 = arith.constant 0 : index
    %c0_122 = arith.constant 0 : index
    %124 = vector.load %arg4[%c8_120, %c0_121, %c0_122] : memref<9x128x128xbf16, #tpu.memory_space<vmem>>, vector<1x128x128xbf16>
    %125 = vector.shape_cast %124 : vector<1x128x128xbf16> to vector<128x128xbf16>
    %cst_123 = arith.constant dense<0.000000e+00> : vector<16x128xf32>
    %126 = tpu.matmul %123, %125, %cst_123 {dimension_numbers = #tpu.dot_dimension_numbers<[1], [0], [0], [1], [0, 0, 1, 1], [], []>} : vector<16x128xbf16>, vector<128x128xbf16>, vector<16x128xf32> -> vector<16x128xf32>
    %127 = arith.addf %121, %126 : vector<16x128xf32>
    %c0_124 = arith.constant 0 : index
    %c0_125 = arith.constant 0 : index
    %128 = vector.load %arg5[%c0_124, %c0_125] : memref<1x128xf32, #tpu.memory_space<vmem>>, vector<1x128xf32>
    %129 = vector.broadcast %128 : vector<1x128xf32> to vector<16x128xf32>
    %130 = arith.addf %127, %129 : vector<16x128xf32>
    %cst_126 = arith.constant 0.000000e+00 : f32
    %131 = vector.broadcast %cst_126 : f32 to vector<16x128xf32>
    %132 = arith.maximumf %130, %131 : vector<16x128xf32>
    %c0_127 = arith.constant 0 : index
    %c0_128 = arith.constant 0 : index
    %c0_129 = arith.constant 0 : index
    %133 = vector.load %arg6[%c0_127, %c0_128, %c0_129] : memref<1x16x128xf32, #tpu.memory_space<vmem>>, vector<1x16x128xf32>
    %134 = vector.shape_cast %133 : vector<1x16x128xf32> to vector<16x128xf32>
    %135 = vector.shape_cast %132 : vector<16x128xf32> to vector<1x16x128xf32>
    tpu.vector_store %arg6[%c0_127, %c0_128, %c0_129], %135 {strides = array<i32>} : memref<1x16x128xf32, #tpu.memory_space<vmem>>, vector<1x16x128xf32>,
    return
  }
  func.func @transform_0(%arg0: i32) -> (i32, i32, i32) {
    %c0_i32 = arith.constant 0 : i32
    %c0_i32_0 = arith.constant 0 : i32
    %c0_i32_1 = arith.constant 0 : i32
    return %arg0, %c0_i32, %c0_i32_0 : i32, i32, i32
  }
  func.func @transform_1(%arg0: i32) -> (i32, i32, i32) {
    %c0_i32 = arith.constant 0 : i32
    %c0_i32_0 = arith.constant 0 : i32
    %c0_i32_1 = arith.constant 0 : i32
    %c0_i32_2 = arith.constant 0 : i32
    return %c0_i32, %c0_i32_0, %c0_i32_1 : i32, i32, i32
  }
  func.func @transform_2(%arg0: i32) -> (i32, i32) {
    %c0_i32 = arith.constant 0 : i32
    %c0_i32_0 = arith.constant 0 : i32
    %c0_i32_1 = arith.constant 0 : i32
    return %c0_i32, %c0_i32_0 : i32, i32
  }
  func.func @transform_3(%arg0: i32) -> (i32, i32, i32) {
    %c0_i32 = arith.constant 0 : i32
    %c0_i32_0 = arith.constant 0 : i32
    %c0_i32_1 = arith.constant 0 : i32
    %c0_i32_2 = arith.constant 0 : i32
    return %c0_i32, %c0_i32_0, %c0_i32_1 : i32, i32, i32
  }
  func.func @transform_4(%arg0: i32) -> (i32, i32) {
    %c0_i32 = arith.constant 0 : i32
    %c0_i32_0 = arith.constant 0 : i32
    %c0_i32_1 = arith.constant 0 : i32
    return %c0_i32, %c0_i32_0 : i32, i32
  }
  func.func @transform_5(%arg0: i32) -> (i32, i32, i32) {
    %c0_i32 = arith.constant 0 : i32
    %c0_i32_0 = arith.constant 0 : i32
    %c0_i32_1 = arith.constant 0 : i32
    return %arg0, %c0_i32, %c0_i32_0 : i32, i32, i32
  }
}

</mosaic_0001>

<bundles_post_ra>
// kernel: tpu_custom_call.1
= control target key start
LH: loop header
LB: loop body
LE: loop exit
PB: predicated region body
PF: predicated region fallthrough
CT: control target
= control target key end

     0   :  { %10 = vsyncpa [#allocation5], 0  ;;  %s2915_s0 = inlined_call_operand.hbm [shape: bf16[2,16,64], index: 0, kind: input, shape index: {}]   ;;  %s2916_s1 = inlined_call_operand.hbm [shape: bf16[9,64,128], index: 1, kind: input, shape index: {}]   ;;  %s2917_s2 = inlined_call_operand.vmem [shape: f32[1,128], index: 2, kind: input, shape index: {}]   ;;  %s2918_s3 = inlined_call_operand.hbm [shape: bf16[9,128,128], index: 3, kind: input, shape index: {}]   ;;  %s2919_s4 = inlined_call_operand.vmem [shape: f32[1,128], index: 4, kind: input, shape index: {}]   ;;  %s2920_s5 = inlined_call_operand.hbm [shape: f32[2,16,128], index: 5, kind: output, shape index: {}]  }
   0x1   :  { %12 = vsyncpa [#allocation5 + $0x1], 0 }
   0x2   :  { %13 = vsyncpa [#allocation8], 0 }
   0x3   :  { %14 = vsyncpa [#allocation6], 0 }
   0x4   :  { %16 = vsyncpa [#allocation6 + $0x1], 0  ;;  %s2677_s18 = smov 0   ;;  %s2679_s19 = smov 0  }
   0x5   :  { %s2681_s20 = smov 0   ;;  %s2683_s21 = smov 0  }
   0x6 LB: > { %s2698_s22 = sadd.s32 4294967295, %s2634_s21   ;;  %s1818_s23 = sadd.s32 4294967294, %s2634_s21   ;;  %s2634_s21 = sphi %s2683_s21, %s2932_s21   ;;  %s2630_s20 = sphi %s2681_s20, %s2931_s20   ;;  %s2626_s19 = sphi %s2679_s19, %s2930_s19   ;;  %s2622_s18 = sphi %s2677_s18, %s2929_s18  }
   0x7   : > { %p42_p0 = scmp.ne.s32.totalorder %s2626_s19, %s2622_s18  ;;  %p43_p1 = scmp.eq.s32.totalorder %s2698_s22, 0 }
   0x8   : > { %p150_p2 = scmp.eq.s32.totalorder %s2698_s22, 1  ;;  %p156_p3 = scmp.eq.s32.totalorder %s1818_s23, 1 }
   0x9   : > { %p2707_p4 = por %p43_p1, %p42_p0  ;;  %p1819_p5 = scmp.ge.s32.totalorder %s2634_s21, 1 }
   0xa   : > { %p2712_p6 = por %p156_p3, %p42_p0  ;;  %p163_p7 = scmp.lt.s32.totalorder %s2634_s21, 3 }
   0xb   : > { %s174_s28 = sshll.u32 %s2916_s1, 4  ;;  %s2636_s30 = smov [#allocation7]   ;;  %s175_s28 = int_to_ptr.hbm [resolvable:$true] %s174_s28 }
   0xc   : > { %p2720_p8 = pnand %p1819_p5, %p163_p7  ;;  %s176_s6 = sshll.u32 %s2636_s30, 4  ;;  %s177_s6 = int_to_ptr.vmem [resolvable:$true] %s176_s6 }
   0xd   : > { %s191_s9 = sshll.u32 %s2918_s3, 4  ;;  %s2921_s10 = smov 64   ;;  %s192_s9 = int_to_ptr.hbm [resolvable:$true] %s191_s9 }
   0xe   : > { %p2403_p9 = pneg %p2720_p8  ;;  %s2638_s11 = smov 4  }
   0xf   : > { %s2639_s12 = smov [#allocation9]   ;;  %s2739_s14 = sadd.s32 1, %s2634_s21  }
  0x10   : > { %p2404_p10 = pnand %p2403_p9, %p43_p1  ;;  %s193_s13 = sshll.u32 %s2639_s12, 4  ;;  %s194_s13 = int_to_ptr.vmem [resolvable:$true] %s193_s13 }
  0x11   : > { %s29_s15 = sadd.s32 1, %s2630_s20  ;;  %s26_s16 = ssub.s32 %s2634_s21, %s2739_s14 }
  0x12   : > { %2406 = dma.hbm_to_vmem [thread:$0]  (!%p2404_p10), %s175_s28, 4608, %s177_s6, [#allocation8], %s2921_s10, %s2921_s10, %s2638_s11  }
  0x13   : > { %2409 = dma.hbm_to_vmem [thread:$0]  (!%p2404_p10), %s192_s9, 9216, %s194_s13, [#allocation8], %s2921_s10, %s2921_s10, %s2638_s11  }
  0x14   : > { %p36_p12 = scmp.ne.s32.totalorder %s2630_s20, %s2626_s19  ;;  %p27_p13 = scmp.eq.s32.totalorder %s26_s16, 0 }
  0x15   : > { %p37_p0 = scmp.eq.s32.totalorder %s2634_s21, 0  ;;  %p2420_p5 = scmp.lt.s32.totalorder %s2634_s21, 2 }
  0x16   : > { %p2749_p3 = por %p150_p2, %p36_p12  ;;  %s210_s26 = sand.u32 1, %s2630_s20  }
  0x17   : > { %s2755_s23 = scalar_select %p27_p13, %s2630_s20, %s29_s15  }
  0x18   : > { %p38_p7 = por %p37_p0, %p36_p12  ;;  %s1823_s27 = sshll.u32 %s210_s26, 3 }
  0x19   : > { %s2277_s28 = sshll.u32 %s2634_s21, 3  ;;  %s214_s8 = scalar_lea.vmem [#allocation4], %s1823_s27 }
  0x1a   : > { %s219_s7 = scalar_lea.hbm %s2915_s0, %s2277_s28  ;;  %s222_s9 = sshll.u32 %s214_s8, 4  ;;  %s223_s9 = int_to_ptr.vmem [resolvable:$true] %s222_s9 }
  0x1b   : > { %s220_s12 = sshll.u32 %s219_s7, 4  ;;  %p2762_p2 = pnand %p2420_p5, %p38_p7  ;;  %s221_s12 = int_to_ptr.hbm [resolvable:$true] %s220_s12 }
  0x1c   : > { %s211_s15 = scalar_lea.sflag [#allocation5], %s210_s26  ;;  %s2534_s16 = sshra.s32 %s221_s12, 4  ;;  %s2535_s16 = int_to_ptr.hbm [resolvable:$true] %s2534_s16 }
  0x1d   : > { %s2536_s10 = scalar_lea.hbm %s2535_s16, 8  ;;  %p2538_p10 = pneg %p2762_p2 }
  0x1e   : > { %p2537_p9 = scmp.ne.s32.totalorder %s2535_s16, %s2536_s10  ;;  %s2541_s30 = scalar_lea.hbm %s2915_s0, 16 }
  0x1f   : > { %p2542_p0 = scmp.lt.s32.totalorder %s2535_s16, %s2915_s0  ;;  %p2543_p5 = scmp.lt.s32.totalorder %s2541_s30, %s2536_s10 }
  0x20   : > { %p2539_p12 = pnand %p2538_p10, %p2537_p9 }
  0x21   : > { %p2544_p7 = por %p2543_p5, %p2542_p0 }
  0x22   : > { %p2540_p13 = pneg %p2539_p12 }
  0x24   : > { %p2545_p11 = pnand %p2544_p7, %p2540_p13 }
  0x26   : > { %2548 = shalt.err (!%p2545_p11)
}
  0x27   : > { %s2927_s26 = smov 64   ;;  %234 = sbr.rel (%p2720_p8) target bundleno = 884 (0x374), region = 40 }
  0x28   : > { %2413 = dma.hbm_to_vmem [thread:$0]  (!%p2762_p2), %s221_s12, 128, %s223_s9, %s211_s15, %s2927_s26, %s2927_s26, %s2638_s11  }
  0x29   : > { %s2782_s8 = sand.u32 (!%p2720_p8), 1, %s2626_s19  }
  0x2a   : > { %s1827_s16 = sshll.u32 (!%p2720_p8), %s2782_s8, 3  ;;  %s237_s10 = scalar_lea.sflag (!%p2720_p8), [#allocation5], %s2782_s8 }
  0x2b   : > { %s240_s28 = scalar_lea.vmem (!%p2720_p8), [#allocation4], %s1827_s16 }
  0x2c   : > { %2609 = dma.done.wait (%p2707_p4), %s237_s10, 128  }
  0x2d   : > { %2611 = vsyncadd (%p2707_p4), %s237_s10, 4294967168 }
  0x2e   : > { %2613 = dma.done.wait (%p43_p1), [#allocation8], 13824  }
  0x2f   : > { %2615 = vsyncadd (%p43_p1), [#allocation8], 4294953472  ;;  %vm279_vm0 = vcmask 581632   ;;  %vm282_vm1 = vcmask 31744   ;;  %v2640_v0 = vmov 0.0   ;;  %vm285_vm2 = vcmask 25600  }
  0x30   : > { %280 = vst.msk [vmem:[#allocation2] sm:$0x1] %vm279_vm0, %v2640_v0  ;;  %vm287_vm3 = vcmask 589344   ;;  %vm290_vm4 = vcmask 583200   ;;  %v2388_v1 = vld [vmem:[%s240_s28] sm:$0xff]   ;;  %s2641_s24 = smov 4  }
  0x31   : > { %281 = vst.msk [vmem:[#allocation2 + $0x11] sm:$0x1] %vm279_vm0, %v2640_v0  ;;  %v2281_v2 = vld [vmem:[#allocation7 + $0x18] sm:$0xff]  ;;  %v2389_v4 = vunpack.c.l.bf16 %v2388_v1  ;;  %v2390_v5 = vunpack.c.h.bf16 %v2388_v1  ;;  %v2280_v7 = vld [vmem:[#allocation7 + $0x10] sm:$0xff]  ;;  %v2279_v9 = vld [vmem:[#allocation7 + $0x8] sm:$0xff]  ;;  %vm304_vm5 = vcmask 556064  }
  0x32   : > { %283 = vst.msk [vmem:[#allocation2] sm:$0xff] %vm282_vm1, %v2640_v0  ;;  %v2293_v3 = vld [vmem:[#allocation7 + $0x78] sm:$0xff]  ;;  %403 = vmatpush.bf16.msra.mxu2 %v2281_v2  ;;  %v2292_v8 = vld [vmem:[#allocation7 + $0x70] sm:$0xff]  ;;  %v2291_v10 = vld [vmem:[#allocation7 + $0x68] sm:$0xff]  ;;  %vm354_vm6 = vcmask 523264   ;;  %s2642_s29 = smov 124  }
  0x33   : > { %284 = vst.msk [vmem:[#allocation2 + $0x8] sm:$0xff] %vm282_vm1, %v2640_v0  ;;  %510 = vmatpush.bf16.msra.mxu3 %v2293_v3  ;;  %v2467_v6 = vpack.i.bf16 %v2390_v5, %v2389_v4  ;;  %v2278_v11 = vld [vmem:[#allocation7] sm:$0xff]  ;;  %v2309_v13 = vld [vmem:[#allocation7 + $0xf8] sm:$0xff]  ;;  %v2308_v15 = vld [vmem:[#allocation7 + $0xf0] sm:$0xff]  ;;  %s2643_s11 = smov 120   ;;  %vm812_vm7 = vcmask 64512  }
  0x34   : > { %286 = vst.msk [vmem:[#allocation2 + $0x10] sm:$0x3] %vm285_vm2, %v2640_v0  ;;  %v2290_v12 = vld [vmem:[#allocation7 + $0x60] sm:$0xff]  ;;  %v2301_v14 = vld [vmem:[#allocation7 + $0xb8] sm:$0xff]  ;;  %v2300_v16 = vld [vmem:[#allocation7 + $0xb0] sm:$0xff]  ;;  %vm817_vm8 = vcmask 130112  }
  0x35   : > { %288 = vst.msk [vmem:[#allocation2] sm:$0xff] %vm287_vm3, %v2640_v0  ;;  %2468 = vrot.lane.b32.xlu0 %v2467_v6, %s2641_s24  ;;  %619 = vmatpush.bf16.msra.mxu1 %v2301_v14  ;;  %v2307_v17 = vld [vmem:[#allocation7 + $0xe8] sm:$0xff]  ;;  %v2306_v21 = vld [vmem:[#allocation7 + $0xe0] sm:$0xff]  ;;  %v2285_v33 = vld [vmem:[#allocation7 + $0x38] sm:$0xff]  ;;  %s2644_s13 = smov 8   ;;  %vm824_vm9 = vcmask 1040384  }
  0x36   : > { %289 = vst.msk [vmem:[#allocation2 + $0x8] sm:$0xff] %vm287_vm3, %v2640_v0  ;;  %404 = vmatpush.bf16.msra.mxu2 %v2280_v7  ;;  %v2299_v31 = vld [vmem:[#allocation7 + $0xa8] sm:$0xff]  ;;  %v2298_v32 = vld [vmem:[#allocation7 + $0xa0] sm:$0xff]  ;;  %v2289_v34 = vld [vmem:[#allocation7 + $0x58] sm:$0xff]  ;;  %362 = vmatpush.bf16.msra.mxu0 %v2285_v33  ;;  %vm815_vm11 = vcmask 58368   ;;  %vm820_vm12 = vcmask 123968  }
  0x37   : > { %291 = vst.msk [vmem:[#allocation2 + $0x10] sm:$0x3] %vm290_vm4, %v2640_v0  ;;  %511 = vmatpush.bf16.msra.mxu3 %v2292_v8  ;;  %v2284_v35 = vld [vmem:[#allocation7 + $0x30] sm:$0xff]  ;;  %v2283_v37 = vld [vmem:[#allocation7 + $0x28] sm:$0xff]  ;;  %v2282_v39 = vld [vmem:[#allocation7 + $0x20] sm:$0xff]  ;;  %vm841_vm13 = vcmask 1047616  }
  0x38   : > { %v2288_v36 = vld [vmem:[#allocation7 + $0x50] sm:$0xff]  ;;  %v2287_v38 = vld [vmem:[#allocation7 + $0x48] sm:$0xff]  ;;  %v2286_v40 = vld [vmem:[#allocation7 + $0x40] sm:$0xff]  ;;  %814 = vst.msk [vmem:[#allocation3 + $0x10] sm:$0xff] %vm812_vm7, %v2640_v0  ;;  %vm837_vm14 = vcmask 1047617   ;;  %vm839_vm15 = vcmask 64513  }
  0x39   : > { %620 = vmatpush.bf16.msra.mxu1 %v2300_v16  ;;  %v2297_v41 = vld [vmem:[#allocation7 + $0x98] sm:$0xff]  ;;  %v2296_v43 = vld [vmem:[#allocation7 + $0x90] sm:$0xff]  ;;  %v2295_v46 = vld [vmem:[#allocation7 + $0x88] sm:$0xff]  ;;  %819 = vst.msk [vmem:[#allocation3 + $0x18] sm:$0xff] %vm817_vm8, %v2640_v0  ;;  %vm844_vm0 = vcmask 1040448   ;;  %vm846_vm1 = vcmask 57344  }
  0x3a   : > { %405 = vmatpush.bf16.msra.mxu2 %v2279_v9  ;;  %363 = vmatpush.bf16.msra.mxu0 %v2284_v35  ;;  %v2305_v42 = vld [vmem:[#allocation7 + $0xd8] sm:$0xff]  ;;  %v2304_v44 = vld [vmem:[#allocation7 + $0xd0] sm:$0xff]  ;;  %v2303_v47 = vld [vmem:[#allocation7 + $0xc8] sm:$0xff]  ;;  %s2645_s15 = smov 112   ;;  %vm1130_vm2 = vsmask.f32 7424 }
  0x3b   : > { %512 = vmatpush.bf16.msra.mxu3 %v2291_v10  ;;  %v2294_v48 = vld [vmem:[#allocation7 + $0x80] sm:$0xff]  ;;  %v2313_v51 = vld [vmem:[#allocation7 + $0x118] sm:$0xff]  ;;  %v2312_v54 = vld [vmem:[#allocation7 + $0x110] sm:$0xff]  ;;  %vm1439_vm3 = vcmask 1046528   ;;  %vm893_vm4 = vcmask 982016   ;;  %s1830_s6 = sshll.u32 %s2782_s8, 4 }
  0x3c   : > { %v2302_v49 = vld [vmem:[#allocation7 + $0xc0] sm:$0xff]  ;;  %v2311_v55 = vld [vmem:[#allocation7 + $0x108] sm:$0xff]  ;;  %v2321_v6 = vld [vmem:[#allocation9 + $0x38] sm:$0xff]  ;;  %s2386_s7 = sshll.u32 %s2698_s22, 4  ;;  %s277_s26 = scalar_lea.vmem [#allocation10], %s1830_s6 }
  0x3d   : > { %621 = vmatpush.bf16.msra.mxu1 %v2299_v31  ;;  %v2310_v56 = vld [vmem:[#allocation7 + $0x100] sm:$0xff]  ;;  %v2320_v9 = vld [vmem:[#allocation9 + $0x30] sm:$0xff]  ;;  %s1722_s28 = scalar_lea.hbm %s2920_s5, %s2386_s7  ;;  %s1723_s24 = sshll.u32 %s277_s26, 4  ;;  %s1724_s24 = int_to_ptr.vmem [resolvable:$true] %s1723_s24 }
  0x3e   : > { %406 = vmatpush.bf16.msra.mxu2 %v2278_v11  ;;  %364 = vmatpush.bf16.msra.mxu0 %v2283_v37  ;;  %s1711_s22 = scalar_lea.sflag [#allocation6], %s2782_s8  ;;  %s2584_s27 = scalar_lea.hbm %s2920_s5, 32 }
  0x3f   : > { %513 = vmatpush.bf16.msra.mxu3 %v2290_v12 }
  0x41   : > { %622 = vmatpush.bf16.msra.mxu1 %v2298_v32 }
  0x42   : > { %455 = vmatpush.bf16.msrb.mxu2 %v2289_v34  ;;  %365 = vmatpush.bf16.msra.mxu0 %v2282_v39 }
  0x43   : > { %729 = vmatpush.bf16.msrb.mxu3 %v2309_v13 }
  0x46   : > { %456 = vmatpush.bf16.msrb.mxu2 %v2288_v36  ;;  %565 = vmatpush.bf16.msrb.mxu0 %v2297_v41  ;;  %v2345_v41 = vld [vmem:[#allocation9 + $0xf8] sm:$0xff] }
  0x47   : > { %730 = vmatpush.bf16.msrb.mxu3 %v2308_v15 }
  0x4a   : > { %457 = vmatpush.bf16.msrb.mxu2 %v2287_v38  ;;  %566 = vmatpush.bf16.msrb.mxu0 %v2296_v43  ;;  %v2318_v43 = vld [vmem:[#allocation9 + $0x20] sm:$0xff] }
  0x4b   : > { %731 = vmatpush.bf16.msrb.mxu3 %v2307_v17 }
  0x4e   : > { %458 = vmatpush.bf16.msrb.mxu2 %v2286_v40  ;;  %567 = vmatpush.bf16.msrb.mxu0 %v2295_v46  ;;  %v2319_v40 = vld [vmem:[#allocation9 + $0x28] sm:$0xff]  ;;  %v2316_v46 = vld [vmem:[#allocation9 + $0x10] sm:$0xff] }
  0x4f   : > { %732 = vmatpush.bf16.msrb.mxu3 %v2306_v21 }
  0x52   : > { %568 = vmatpush.bf16.msrb.mxu0 %v2294_v48  ;;  %v2315_v48 = vld [vmem:[#allocation9 + $0x8] sm:$0xff] }
  0xa7   : > { %v2469_v18 = vpop.permute.xlu0 %2468 }
  0xa8   : > { %v2471_v19 = vunpack.i.h.bf16 %v2469_v18  ;;  %v2470_v20 = vunpack.i.l.bf16 %v2469_v18 }
  0xaa   : > { %305 = vst.msk [vmem:[#allocation2 + $0x1] sm:$0xff] %vm304_vm5, %v2470_v20 }
  0xab   : > { %306 = vst.msk [vmem:[#allocation2 + $0x9] sm:$0xff] %vm304_vm5, %v2471_v19  ;;  %vm1041_vm5 = vcmask 916480  }
  0xb1   : > { %v467_v22 = vld [vmem:[#allocation2 + $0x1] sm:$0xff] }
  0xb2   : > { %v307_v23 = vld [vmem:[#allocation2] sm:$0xff]  ;;  %v632_v25 = vld [vmem:[#allocation2 + $0xa] sm:$0xff] }
  0xb3   : > { %v631_v24 = vld [vmem:[#allocation2 + $0x2] sm:$0xff] }
  0xb4   : > { %v468_v26 = vld [vmem:[#allocation2 + $0x9] sm:$0xff]  ;;  %v2802_v27 = vpack.c.bf16 %v632_v25, %v631_v24 }
  0xb5   : > { %v469_v28 = vpack.c.bf16 %v468_v26, %v467_v22  ;;  %v308_v29 = vld [vmem:[#allocation2 + $0x8] sm:$0xff] }
  0xb6   : > { %v309_v30 = vpack.c.bf16 %v308_v29, %v307_v23  ;;  %696 = vrot.lane.b32.xlu2 %v2802_v27, %s2642_s29  ;;  %v2472_v23 = vld [vmem:[%s2917_s2] ss:$0 sm:$0xff] }
  0xb7   : > { %1898 = vmatmul.msk.bf16.vlgmr.msra.gmra.mxu3 %vm354_vm6, %v469_v28 }
  0xb8   : > { %422 = vrot.lane.b32.xlu1 %v309_v30, %s2643_s11  ;;  %328 = vrot.lane.b32.xlu0 %v309_v30, %s2642_s29 }
  0xb9   : > { %1864 = vmatmul.msk.bf16.vlgmr.msra.gmra.mxu2 %vm354_vm6, %v309_v30 }
  0xba   : > { %674 = vmatpush.bf16.msra.mxu2 %v2305_v42  ;;  %v803_v42 = vlaneseq }
  0xbc   : > { %vm805_vm10 = vcmp.lt.s32.totalorder %v803_v42, 144 }
  0xbd   : > { %807 = vst.msk [vmem:[#allocation3] ss:$8 sm:$0x3] %vm805_vm10, %v2640_v0 }
  0xbe   : > { %586 = vrot.lane.b32.xlu2 %v469_v28, %s2643_s11  ;;  %675 = vmatpush.bf16.msra.mxu2 %v2304_v44  ;;  %v2344_v44 = vld [vmem:[#allocation9 + $0xf0] sm:$0xff]  ;;  %813 = vst.msk [vmem:[#allocation3] sm:$0xff] %vm812_vm7, %v2640_v0 }
  0xbf   : > { %818 = vst.msk [vmem:[#allocation3 + $0x8] sm:$0xff] %vm817_vm8, %v2640_v0 }
  0xc0   : > { %532 = vrot.lane.b32.xlu1 %v469_v28, %s2642_s29  ;;  %750 = vrot.lane.b32.xlu0 %v2802_v27, %s2643_s11  ;;  %810 = vst.msk [vmem:[#allocation3 + $0x21] ss:$8 sm:$0x3] %vm805_vm10, %v2640_v0  ;;  %s1725_s29 = sshll.u32 %s1722_s28, 4  ;;  %s1726_s29 = int_to_ptr.hbm [resolvable:$true] %s1725_s29 }
  0xc1   : > { %816 = vst.msk [vmem:[#allocation3 + $0x20] sm:$0x3] %vm815_vm11, %v2640_v0 }
  0xc2   : > { %676 = vmatpush.bf16.msra.mxu2 %v2303_v47  ;;  %v2343_v47 = vld [vmem:[#allocation9 + $0xe8] sm:$0xff]  ;;  %821 = vst.msk [vmem:[#allocation3 + $0x28] sm:$0x3] %vm820_vm12, %v2640_v0 }
  0xc6   : > { %677 = vmatpush.bf16.msra.mxu2 %v2302_v49  ;;  %v2342_v49 = vld [vmem:[#allocation9 + $0xe0] sm:$0xff] }
 0x110   : > { %v697_v45 = vpop.permute.xlu2 %696 }
 0x111   : > { %1966 = vmatmul.msk.bf16.vlgmr.msrb.gmra.mxu3 %vm354_vm6, %v697_v45  ;;  %v2317_v45 = vld [vmem:[#allocation9 + $0x18] sm:$0xff] }
 0x118   : > { %v587_v50 = vpop.permute.xlu2 %586 }
 0x119   : > { %1932 = vmatmul.msk.bf16.vlgmr.msra.gmra.mxu1 %vm354_vm6, %v587_v50  ;;  %v2314_v50 = vld [vmem:[#allocation9] sm:$0xff] }
 0x12a   : > { %v423_v52 = vpop.permute.xlu1 %422  ;;  %v329_v53 = vpop.permute.xlu0 %328 }
 0x12b   : > { %1847 = vmatmul.msk.bf16.vlgmr.msra.gmra.mxu0 %vm354_vm6, %v329_v53  ;;  %1881 = vmatmul.msk.bf16.vlgmr.msrb.gmra.mxu2 %vm354_vm6, %v423_v52  ;;  %v2340_v52 = vld [vmem:[#allocation9 + $0xd0] sm:$0xff]  ;;  %v2339_v53 = vld [vmem:[#allocation9 + $0xc8] sm:$0xff] }
 0x12c   : > { %783 = vmatpush.bf16.msra.mxu0 %v2313_v51  ;;  %1006 = vmatpush.bf16.msrb.mxu2 %v2321_v6  ;;  %v2341_v51 = vld [vmem:[#allocation9 + $0xd8] sm:$0xff] }
 0x130   : > { %784 = vmatpush.bf16.msra.mxu0 %v2312_v54  ;;  %1007 = vmatpush.bf16.msrb.mxu2 %v2320_v9  ;;  %v2328_v9 = vld [vmem:[#allocation9 + $0x70] sm:$0xff] }
 0x132   : > { %v533_v57 = vpop.permute.xlu1 %532  ;;  %v751_v58 = vpop.permute.xlu0 %750 }
 0x134   : > { %785 = vmatpush.bf16.msra.mxu0 %v2311_v55  ;;  %1008 = vmatpush.bf16.msrb.mxu2 %v2319_v40  ;;  %v2338_v55 = vld [vmem:[#allocation9 + $0xc0] sm:$0xff] }
 0x138   : > { %786 = vmatpush.bf16.msra.mxu0 %v2310_v56  ;;  %1009 = vmatpush.bf16.msrb.mxu2 %v2318_v43 }
 0x13a   : > { %v515_v1 = vpop.f32.mrf.mxu3 }
 0x13b   : > { %1915 = vmatmul.msk.bf16.vlgmr.msrb.gmra.mxu0 %vm354_vm6, %v533_v57  ;;  %1949 = vmatmul.msk.bf16.vlgmr.msra.gmra.mxu2 %vm354_vm6, %v2802_v27 }
 0x13c   : > { %v408_v59 = vpop.f32.mrf.mxu2  ;;  %1192 = vmatpush.bf16.msrb.mxu0 %v2345_v41  ;;  %1010 = vmatpush.bf16.msrb.mxu2 %v2317_v45  ;;  %v2326_v41 = vld [vmem:[#allocation9 + $0x60] sm:$0xff] }
 0x140   : > { %1193 = vmatpush.bf16.msrb.mxu0 %v2344_v44  ;;  %1011 = vmatpush.bf16.msrb.mxu2 %v2316_v46 }
 0x142   : > { %v517_v8 = vpop.f32.mrf.mxu3 }
 0x144   : > { %v410_v60 = vpop.f32.mrf.mxu2  ;;  %1194 = vmatpush.bf16.msrb.mxu0 %v2343_v47  ;;  %1012 = vmatpush.bf16.msrb.mxu2 %v2315_v48 }
 0x148   : > { %1195 = vmatpush.bf16.msrb.mxu0 %v2342_v49  ;;  %1013 = vmatpush.bf16.msrb.mxu2 %v2314_v50 }
 0x14b   : > { %1983 = vmatmul.msk.bf16.vlgmr.msra.gmra.mxu0 %vm354_vm6, %v751_v58 }
 0x14c   : > { %1196 = vmatpush.bf16.msrb.mxu0 %v2341_v51 }
 0x150   : > { %1197 = vmatpush.bf16.msrb.mxu0 %v2340_v52  ;;  %v2325_v52 = vld [vmem:[#allocation9 + $0x58] sm:$0xff] }
 0x154   : > { %1198 = vmatpush.bf16.msrb.mxu0 %v2339_v53 }
 0x158   : > { %1199 = vmatpush.bf16.msrb.mxu0 %v2338_v55 }
 0x194   : > { %v734_v19 = vpop.f32.mrf.mxu3 }
 0x196   : > { %v624_v10 = vpop.f32.mrf.mxu1 }
 0x19c   : > { %v736_v31 = vpop.f32.mrf.mxu3 }
 0x19e   : > { %v626_v21 = vpop.f32.mrf.mxu1 }
 0x1a8   : > { %v367_v61 = vpop.f32.mrf.mxu0 }
 0x1a9   : > { %v409_v2 = vadd.f32 %v408_v59, %v367_v61 }
 0x1ae   : > { %v460_v62 = vpop.f32.mrf.mxu2 }
 0x1af   : > { %v465_v4 = vadd.f32 %v460_v62, %v409_v2 }
 0x1b0   : > { %v369_v63 = vpop.f32.mrf.mxu0 }
 0x1b1   : > { %v520_v7 = vadd.f32 %v515_v1, %v465_v4  ;;  %v411_v11 = vadd.f32 %v410_v60, %v369_v63  ;;  %v2329_v4 = vld [vmem:[#allocation9 + $0x78] sm:$0xff] }
 0x1b2   : > { %944 = vmatpush.bf16.msrb.mxu1 %v2329_v4  ;;  %v2333_v4 = vld [vmem:[#allocation9 + $0x98] sm:$0xff] }
 0x1b6   : > { %v462_v3 = vpop.f32.mrf.mxu2  ;;  %945 = vmatpush.bf16.msrb.mxu1 %v2328_v9  ;;  %v2331_v9 = vld [vmem:[#allocation9 + $0x88] sm:$0xff] }
 0x1b7   : > { %v466_v14 = vadd.f32 %v462_v3, %v411_v11 }
 0x1b8   : > { %v570_v5 = vpop.f32.mrf.mxu0 }
 0x1b9   : > { %v575_v12 = vadd.f32 %v570_v5, %v520_v7  ;;  %v521_v18 = vadd.f32 %v517_v8, %v466_v14 }
 0x1bb   : > { %v629_v16 = vadd.f32 %v624_v10, %v575_v12  ;;  %v2337_v10 = vld [vmem:[#allocation9 + $0xb8] sm:$0xff]  ;;  %v2336_v12 = vld [vmem:[#allocation9 + $0xb0] sm:$0xff] }
 0x1bc   : > { %1092 = vmatpush.bf16.msra.mxu3 %v2337_v10  ;;  %v2349_v10 = vld [vmem:[#allocation9 + $0x118] sm:$0xff] }
 0x1be   : > { %v679_v13 = vpop.f32.mrf.mxu2 }
 0x1bf   : > { %v684_v17 = vadd.f32 %v679_v13, %v629_v16  ;;  %v2327_v16 = vld [vmem:[#allocation9 + $0x68] sm:$0xff] }
 0x1c0   : > { %v572_v15 = vpop.f32.mrf.mxu0  ;;  %1093 = vmatpush.bf16.msra.mxu3 %v2336_v12  ;;  %946 = vmatpush.bf16.msrb.mxu1 %v2327_v16  ;;  %v2330_v12 = vld [vmem:[#allocation9 + $0x80] sm:$0xff]  ;;  %v2369_v16 = vld [vmem:[#allocation9 + $0x1b8] sm:$0xff] }
 0x1c1   : > { %v576_v20 = vadd.f32 %v572_v15, %v521_v18  ;;  %v739_v22 = vadd.f32 %v734_v19, %v684_v17 }
 0x1c3   : > { %v630_v26 = vadd.f32 %v626_v21, %v576_v20 }
 0x1c4   : > { %947 = vmatpush.bf16.msrb.mxu1 %v2326_v41 }
 0x1c6   : > { %v681_v24 = vpop.f32.mrf.mxu2 }
 0x1c7   : > { %v685_v28 = vadd.f32 %v681_v24, %v630_v26 }
 0x1c8   : > { %v788_v25 = vpop.f32.mrf.mxu0  ;;  %948 = vmatpush.bf16.msrb.mxu1 %v2325_v52 }
 0x1c9   : > { %v793_v27 = vadd.f32 %v788_v25, %v739_v22  ;;  %v740_v33 = vadd.f32 %v736_v31, %v685_v28  ;;  %v2335_v31 = vld [vmem:[#allocation9 + $0xa8] sm:$0xff] }
 0x1ca   : > { %1094 = vmatpush.bf16.msra.mxu3 %v2335_v31  ;;  %v2354_v31 = vld [vmem:[#allocation9 + $0x140] sm:$0xff] }
 0x1cb   : > { %v799_v29 = vadd.f32 %v2472_v23, %v793_v27 }
 0x1cd   : > { %v801_v30 = vmax.f32 %v799_v29, 0.0 }
 0x1cf   : > { %v825_v32 = vrot.slane %v801_v30, 7 }
 0x1d0   : > { %v790_v34 = vpop.f32.mrf.mxu0 }
 0x1d1   : > { %v794_v35 = vadd.f32 %v790_v34, %v740_v33  ;;  %828 = vrot.lane.b32.xlu1 %v825_v32, %s2644_s13 }
 0x1d3   : > { %v800_v36 = vadd.f32 %v2472_v23, %v794_v35 }
 0x1d5   : > { %v802_v37 = vmax.f32 %v800_v36, 0.0 }
 0x1d7   : > { %v826_v38 = vrot.slane %v802_v37, 7 }
 0x1d9   : > { %832 = vrot.lane.b32.xlu0 %v826_v38, %s2644_s13  ;;  %v827_v39 = vsel %vm824_vm9, %v825_v32, %v826_v38 }
 0x1da   : > { %830 = vrot.lane.b32.xlu2 %v827_v39, %s2644_s13 }
 0x234   : > { %v831_v54 = vpop.permute.xlu2 %830 }
 0x235   : > { %842 = vst.msk [vmem:[#allocation3 + $0x10] sm:$0xff] %vm841_vm13, %v831_v54 }
 0x236   : > { %843 = vst.msk [vmem:[#allocation3 + $0x18] sm:$0xff] %vm812_vm7, %v831_v54 }
 0x23c   : > { %v2840_v57 = vld [vmem:[#allocation3 + $0x10] sm:$0xff] }
 0x23d   : > { %v2838_v56 = vld [vmem:[#allocation3 + $0x18] sm:$0xff] }
 0x243   : > { %v829_v0 = vpop.permute.xlu1 %828 }
 0x244   : > { %838 = vst.msk [vmem:[#allocation3] sm:$0xfe] %vm837_vm14, %v829_v0 }
 0x245   : > { %840 = vst.msk [vmem:[#allocation3 + $0x8] sm:$0xfe] %vm839_vm15, %v829_v0 }
 0x24b   : > { %v833_v58 = vpop.permute.xlu0 %832  ;;  %v848_v59 = vld [vmem:[#allocation3] sm:$0xff] }
 0x24c   : > { %v1208_v60 = vld [vmem:[#allocation3] sm:$0xfe]  ;;  %845 = vst.msk [vmem:[#allocation3 + $0x20] sm:$0x1] %vm844_vm0, %v833_v58  ;;  %v867_v62 = vld [vmem:[#allocation3 + $0x8] sm:$0xff]  ;;  %v850_v63 = vpack.c.bf16 %v2840_v57, %v848_v59 }
 0x24d   : > { %v1108_v61 = vld [vmem:[#allocation3] sm:$0xfe]  ;;  %v1214_v1 = vpack.c.bf16 %v2840_v57, %v1208_v60  ;;  %v1209_v3 = vld [vmem:[#allocation3 + $0x8] sm:$0xfe]  ;;  %847 = vst.msk [vmem:[#allocation3 + $0x28] sm:$0x1] %vm846_vm1, %v833_v58  ;;  %v869_v5 = vpack.c.bf16 %v2838_v56, %v867_v62 }
 0x24e   : > { %v1111_v2 = vpack.c.bf16 %v2840_v57, %v1108_v61  ;;  %v1215_v6 = vpack.c.bf16 %v2838_v56, %v1209_v3  ;;  %1037 = vrot.lane.b32.xlu0 %v850_v63, %s2645_s15  ;;  %889 = vrot.lane.b32.xlu1 %v850_v63, %s2643_s11  ;;  %v1416_v13 = vld [vmem:[#allocation3] sm:$0xfc]  ;;  %v1509_v51 = vld [vmem:[#allocation3 + $0x8] sm:$0xfc]  ;;  %v2324_v58 = vld [vmem:[#allocation9 + $0x50] sm:$0xff] }
 0x24f   : > { %891 = vrot.lane.b32.xlu2 %v869_v5, %s2643_s11  ;;  %1014 = vmatmul.bf16.vlgmr.msrb.gmra.mxu2 %v850_v63  ;;  %v1238_v7 = vshll.u32 %v1214_v1, 16  ;;  %v1418_v17 = vpack.c.bf16 %v2840_v57, %v1416_v13  ;;  %v1236_v27 = vshrl.u32 %v1214_v1, 16  ;;  %v1508_v47 = vld [vmem:[#allocation3] sm:$0xfc]  ;;  %v1513_v0 = vpack.c.bf16 %v2838_v56, %v1509_v51  ;;  %v2323_v63 = vld [vmem:[#allocation9 + $0x48] sm:$0xff]  ;;  %v2353_v56 = vld [vmem:[#allocation9 + $0x138] sm:$0xff] }
 0x250   : > { %v1134_v8 = vshll.u32 %v1111_v2, 16  ;;  %v1250_v11 = vshll.u32 %v1215_v6, 16  ;;  %v1132_v29 = vshrl.u32 %v1111_v2, 16  ;;  %v1248_v32 = vshrl.u32 %v1215_v6, 16  ;;  %949 = vmatpush.bf16.msrb.mxu1 %v2324_v58  ;;  %v2322_v1 = vld [vmem:[#allocation9 + $0x40] sm:$0xff]  ;;  %v2352_v3 = vld [vmem:[#allocation9 + $0x130] sm:$0xff] }
 0x251   : > { %v1240_v19 = vrot.slane %v1238_v7, 1  ;;  %v1440_v34 = vrot.slane %v1418_v17, 1  ;;  %v1512_v53 = vpack.c.bf16 %v2840_v57, %v1508_v47  ;;  %v1540_v62 = vrot.slane %v1513_v0, 1  ;;  %v2334_v2 = vld [vmem:[#allocation9 + $0xa0] sm:$0xff]  ;;  %v2361_v6 = vld [vmem:[#allocation9 + $0x178] sm:$0xff]  ;;  %v2332_v7 = vld [vmem:[#allocation9 + $0x90] sm:$0xff] }
 0x252   : > { %v1136_v21 = vrot.slane %v1134_v8, 1  ;;  %v1252_v25 = vrot.slane %v1250_v11, 1  ;;  %1095 = vmatpush.bf16.msra.mxu3 %v2334_v2  ;;  %1400 = vmatpush.bf16.msra.mxu2 %v2361_v6  ;;  %v2350_v8 = vld [vmem:[#allocation9 + $0x120] sm:$0xff]  ;;  %v2360_v11 = vld [vmem:[#allocation9 + $0x170] sm:$0xff]  ;;  %v2347_v17 = vld [vmem:[#allocation9 + $0x108] sm:$0xff] }
 0x253   : > { %v1212_v14 = vld [vmem:[#allocation3 + $0x20] sm:$0x1]  ;;  %v1241_v36 = vor.u32 %v1240_v19, %v1236_v27  ;;  %v1537_v59 = vrot.slane %v1512_v53, 1  ;;  %v2348_v13 = vld [vmem:[#allocation9 + $0x110] sm:$0xff]  ;;  %v2381_v51 = vld [vmem:[#allocation9 + $0x218] sm:$0xff] }
 0x254   : > { %v1110_v15 = vld [vmem:[#allocation3 + $0x20] sm:$0x1]  ;;  %v1216_v18 = vpack.c.bf16 %v1212_v14, %v1212_v14  ;;  %v1213_v22 = vld [vmem:[#allocation3 + $0x28] sm:$0x1]  ;;  %v1137_v38 = vor.u32 %v1136_v21, %v1132_v29  ;;  %v1253_v42 = vor.u32 %v1252_v25, %v1248_v32  ;;  %950 = vmatpush.bf16.msrb.mxu1 %v2323_v63  ;;  %v2377_v14 = vld [vmem:[#allocation9 + $0x1f8] sm:$0xff] }
 0x255   : > { %v1112_v20 = vpack.c.bf16 %v1110_v15, %v1110_v15  ;;  %v1417_v23 = vld [vmem:[#allocation3 + $0x20] sm:$0x3]  ;;  %v1217_v24 = vpack.c.bf16 %v1213_v22, %v1213_v22  ;;  %v1511_v48 = vld [vmem:[#allocation3 + $0x28] sm:$0x3]  ;;  %1597 = vmatpush.bf16.msra.mxu0 %v2377_v14  ;;  %v2368_v19 = vld [vmem:[#allocation9 + $0x1b0] sm:$0xff] }
 0x256   : > { %v1419_v26 = vpack.c.bf16 %v1417_v23, %v1417_v23  ;;  %1039 = vrot.lane.b32.xlu1 %v869_v5, %s2645_s15  ;;  %v1243_v28 = vshll.u32 %v1216_v18, 16  ;;  %v1510_v40 = vld [vmem:[#allocation3 + $0x20] sm:$0x3]  ;;  %v1515_v54 = vpack.c.bf16 %v1511_v48, %v1511_v48  ;;  %v2351_v5 = vld [vmem:[#allocation9 + $0x128] sm:$0xff]  ;;  %1096 = vmatpush.bf16.msra.mxu3 %v2333_v4  ;;  %v2357_v22 = vld [vmem:[#allocation9 + $0x158] sm:$0xff] }
 0x257   : > { %v1139_v30 = vshll.u32 %v1112_v20, 16  ;;  %v1255_v33 = vshll.u32 %v1217_v24, 16  ;;  %v1514_v50 = vpack.c.bf16 %v1510_v40, %v1510_v40  ;;  %1401 = vmatpush.bf16.msra.mxu2 %v2360_v11  ;;  %v2359_v15 = vld [vmem:[#allocation9 + $0x168] sm:$0xff]  ;;  %v2358_v18 = vld [vmem:[#allocation9 + $0x160] sm:$0xff]  ;;  %v2376_v20 = vld [vmem:[#allocation9 + $0x1f0] sm:$0xff] }
 0x258   : > { %v1441_v35 = vrot.slane %v1419_v26, 1  ;;  %v1245_v37 = vrot.slane %v1243_v28, 1  ;;  %v1541_v60 = vrot.slane %v1515_v54, 1  ;;  %951 = vmatpush.bf16.msrb.mxu1 %v2322_v1  ;;  %v2346_v21 = vld [vmem:[#allocation9 + $0x100] sm:$0xff]  ;;  %v2367_v23 = vld [vmem:[#allocation9 + $0x1a8] sm:$0xff]  ;;  %v2356_v25 = vld [vmem:[#allocation9 + $0x150] sm:$0xff] }
 0x259   : > { %v1141_v39 = vrot.slane %v1139_v30, 1  ;;  %v1257_v43 = vrot.slane %v1255_v33, 1  ;;  %v1538_v55 = vrot.slane %v1514_v50, 1  ;;  %1598 = vmatpush.bf16.msra.mxu0 %v2376_v20  ;;  %v2375_v24 = vld [vmem:[#allocation9 + $0x1e8] sm:$0xff]  ;;  %v2366_v26 = vld [vmem:[#allocation9 + $0x1a0] sm:$0xff]  ;;  %v2365_v29 = vld [vmem:[#allocation9 + $0x198] sm:$0xff] }
 0x25a   : > { %v2853_v44 = vsel %vm1439_vm3, %v1440_v34, %v1441_v35  ;;  %v1246_v45 = vsel %vm1130_vm2, %v1241_v36, %v1245_v37  ;;  %v1542_v57 = vsel %vm1439_vm3, %v1540_v62, %v1541_v60  ;;  %1097 = vmatpush.bf16.msra.mxu3 %v2332_v7  ;;  %v2374_v27 = vld [vmem:[#allocation9 + $0x1e0] sm:$0xff]  ;;  %v2355_v28 = vld [vmem:[#allocation9 + $0x148] sm:$0xff]  ;;  %v2373_v30 = vld [vmem:[#allocation9 + $0x1d8] sm:$0xff] }
 0x25b   : > { %v1142_v46 = vsel %vm1130_vm2, %v1137_v38, %v1141_v39  ;;  %1259 = vrot.lane.b32.xlu2 %v1246_v45, %s2643_s11  ;;  %v1258_v49 = vsel %vm1130_vm2, %v1253_v42, %v1257_v43  ;;  %v1539_v61 = vsel %vm1439_vm3, %v1537_v59, %v1538_v55  ;;  %1402 = vmatpush.bf16.msra.mxu2 %v2359_v15  ;;  %v2364_v32 = vld [vmem:[#allocation9 + $0x190] sm:$0xff]  ;;  %v2363_v34 = vld [vmem:[#allocation9 + $0x188] sm:$0xff]  ;;  %v2362_v36 = vld [vmem:[#allocation9 + $0x180] sm:$0xff] }
 0x25c   : > { %1200 = vmatmul.bf16.vlgmr.msrb.gmra.mxu0 %v1142_v46  ;;  %1261 = vrot.lane.b32.xlu0 %v1258_v49, %s2643_s11  ;;  %v2372_v33 = vld [vmem:[#allocation9 + $0x1d0] sm:$0xff]  ;;  %v2371_v35 = vld [vmem:[#allocation9 + $0x1c8] sm:$0xff]  ;;  %v2370_v37 = vld [vmem:[#allocation9 + $0x1c0] sm:$0xff] }
 0x25d   : > { %1313 = vmatpush.bf16.msra.mxu1 %v2353_v56  ;;  %1599 = vmatpush.bf16.msra.mxu0 %v2375_v24  ;;  %v2385_v39 = vld [vmem:[#allocation9 + $0x238] sm:$0xff]  ;;  %v2384_v42 = vld [vmem:[#allocation9 + $0x230] sm:$0xff]  ;;  %v2383_v46 = vld [vmem:[#allocation9 + $0x228] sm:$0xff] }
 0x25e   : > { %1346 = vrot.lane.b32.xlu1 %v1246_v45, %s2645_s15  ;;  %1098 = vmatpush.bf16.msra.mxu3 %v2331_v9  ;;  %v2380_v0 = vld [vmem:[#allocation9 + $0x210] sm:$0xff]  ;;  %v2379_v59 = vld [vmem:[#allocation9 + $0x208] sm:$0xff]  ;;  %v2378_v62 = vld [vmem:[#allocation9 + $0x200] sm:$0xff] }
 0x25f   : > { %1403 = vmatpush.bf16.msra.mxu2 %v2358_v18  ;;  %v2473_v24 = vld [vmem:[%s2919_s4] ss:$0 sm:$0xff] }
 0x261   : > { %1314 = vmatpush.bf16.msra.mxu1 %v2352_v3  ;;  %1600 = vmatpush.bf16.msra.mxu0 %v2374_v27 }
 0x262   : > { %1099 = vmatpush.bf16.msra.mxu3 %v2330_v12 }
 0x263   : > { %1348 = vrot.lane.b32.xlu2 %v1258_v49, %s2645_s15  ;;  %1404 = vmatpush.bf16.msra.mxu2 %v2357_v22  ;;  %v2382_v49 = vld [vmem:[#allocation9 + $0x220] sm:$0xff] }
 0x264   : > { %1543 = vrot.lane.b32.xlu0 %v1539_v61, %s2643_s11 }
 0x265   : > { %1315 = vmatpush.bf16.msra.mxu1 %v2351_v5  ;;  %1601 = vmatpush.bf16.msra.mxu0 %v2373_v30 }
 0x266   : > { %1545 = vrot.lane.b32.xlu1 %v1542_v57, %s2643_s11  ;;  %1492 = vmatpush.bf16.msrb.mxu3 %v2369_v16  ;;  %s2578_s11 = sshra.s32 %s1726_s29, 4  ;;  %s2579_s11 = int_to_ptr.hbm [resolvable:$true] %s2578_s11 }
 0x267   : > { %1405 = vmatpush.bf16.msra.mxu2 %v2356_v25  ;;  %s2580_s9 = scalar_lea.hbm %s2579_s11, 16  ;;  %p2585_p11 = scmp.lt.s32.totalorder %s2579_s11, %s2920_s5 }
 0x268   : > { %p2581_p1 = scmp.ne.s32.totalorder %s2579_s11, %s2580_s9  ;;  %p2586_p2 = scmp.lt.s32.totalorder %s2584_s27, %s2580_s9 }
 0x269   : > { %1316 = vmatpush.bf16.msra.mxu1 %v2350_v8  ;;  %1602 = vmatpush.bf16.msra.mxu0 %v2372_v33 }
 0x26a   : > { %1493 = vmatpush.bf16.msrb.mxu3 %v2368_v19  ;;  %p2582_p4 = pnand %p2581_p1, %p2749_p3  ;;  %p2587_p9 = por %p2586_p2, %p2585_p11 }
 0x26b   : > { %1630 = vrot.lane.b32.xlu2 %v1539_v61, %s2645_s15  ;;  %1406 = vmatpush.bf16.msra.mxu2 %v2355_v28 }
 0x26c   : > { %1632 = vrot.lane.b32.xlu0 %v1542_v57, %s2645_s15  ;;  %p2583_p8 = pneg %p2582_p4 }
 0x26d   : > { %1317 = vmatpush.bf16.msra.mxu1 %v2349_v10  ;;  %1603 = vmatpush.bf16.msra.mxu0 %v2371_v35 }
 0x26e   : > { %1494 = vmatpush.bf16.msrb.mxu3 %v2367_v23  ;;  %p2588_p10 = pnand %p2587_p9, %p2583_p8 }
 0x26f   : > { %1407 = vmatpush.bf16.msra.mxu2 %v2354_v31 }
 0x271   : > { %1318 = vmatpush.bf16.msra.mxu1 %v2348_v13  ;;  %1604 = vmatpush.bf16.msra.mxu0 %v2370_v37 }
 0x272   : > { %1495 = vmatpush.bf16.msrb.mxu3 %v2366_v26 }
 0x275   : > { %1319 = vmatpush.bf16.msra.mxu1 %v2347_v17 }
 0x276   : > { %1496 = vmatpush.bf16.msrb.mxu3 %v2365_v29 }
 0x279   : > { %1320 = vmatpush.bf16.msra.mxu1 %v2346_v21 }
 0x27a   : > { %1497 = vmatpush.bf16.msrb.mxu3 %v2364_v32 }
 0x27e   : > { %1498 = vmatpush.bf16.msrb.mxu3 %v2363_v34 }
 0x282   : > { %1499 = vmatpush.bf16.msrb.mxu3 %v2362_v36 }
 0x2a9   : > { %v892_v38 = vpop.permute.xlu2 %891 }
 0x2b5   : > { %v1260_v43 = vpop.permute.xlu2 %1259 }
 0x2bd   : > { %v1349_v52 = vpop.permute.xlu2 %1348 }
 0x2c0   : > { %v890_v40 = vpop.permute.xlu1 %889  ;;  %v1038_v45 = vpop.permute.xlu0 %1037 }
 0x2c1   : > { %v894_v41 = vsel %vm893_vm4, %v890_v40, %v892_v38 }
 0x2c2   : > { %952 = vmatmul.bf16.vlgmr.msrb.gmra.mxu1 %v894_v41 }
 0x2c3   : > { %1684 = vmatpush.bf16.msrb.mxu1 %v2385_v39 }
 0x2c5   : > { %v1631_v57 = vpop.permute.xlu2 %1630 }
 0x2c7   : > { %1685 = vmatpush.bf16.msrb.mxu1 %v2384_v42 }
 0x2c8   : > { %v1040_v47 = vpop.permute.xlu1 %1039 }
 0x2c9   : > { %v1042_v48 = vsel %vm1041_vm5, %v1038_v45, %v1040_v47 }
 0x2ca   : > { %1100 = vmatmul.bf16.vlgmr.msra.gmra.mxu3 %v1042_v48 }
 0x2cb   : > { %1686 = vmatpush.bf16.msrb.mxu1 %v2383_v46 }
 0x2ce   : > { %v1262_v50 = vpop.permute.xlu0 %1261 }
 0x2cf   : > { %1687 = vmatpush.bf16.msrb.mxu1 %v2382_v49  ;;  %v1263_v54 = vsel %vm893_vm4, %v1260_v43, %v1262_v50 }
 0x2d0   : > { %v1347_v53 = vpop.permute.xlu1 %1346 }
 0x2d1   : > { %v1350_v55 = vsel %vm1041_vm5, %v1347_v53, %v1349_v52 }
 0x2d2   : > { %1321 = vmatmul.bf16.vlgmr.msra.gmra.mxu1 %v1263_v54  ;;  %1408 = vmatmul.bf16.vlgmr.msra.gmra.mxu2 %v1350_v55  ;;  %v1015_v2 = vpop.f32.mrf.mxu2 }
 0x2d3   : > { %1688 = vmatpush.bf16.msrb.mxu1 %v2381_v51 }
 0x2d6   : > { %v1544_v58 = vpop.permute.xlu0 %1543 }
 0x2d7   : > { %1689 = vmatpush.bf16.msrb.mxu1 %v2380_v0 }
 0x2d8   : > { %v1546_v60 = vpop.permute.xlu1 %1545 }
 0x2d9   : > { %v1547_v61 = vsel %vm893_vm4, %v1544_v58, %v1546_v60  ;;  %v1201_v4 = vpop.f32.mrf.mxu0 }
 0x2da   : > { %1500 = vmatmul.bf16.vlgmr.msrb.gmra.mxu3 %v2853_v44  ;;  %1605 = vmatmul.bf16.vlgmr.msra.gmra.mxu0 %v1547_v61  ;;  %v1017_v6 = vpop.f32.mrf.mxu2 }
 0x2db   : > { %1690 = vmatpush.bf16.msrb.mxu1 %v2379_v59 }
 0x2de   : > { %v1633_v63 = vpop.permute.xlu0 %1632 }
 0x2df   : > { %1691 = vmatpush.bf16.msrb.mxu1 %v2378_v62  ;;  %v1634_v1 = vsel %vm1041_vm5, %v1631_v57, %v1633_v63 }
 0x2e1   : > { %v1203_v10 = vpop.f32.mrf.mxu0 }
 0x2e2   : > { %1692 = vmatmul.bf16.vlgmr.msrb.gmra.mxu1 %v1634_v1 }
 0x33f   : > { %v953_v56 = vpop.f32.mrf.mxu1 }
 0x340   : > { %v1016_v8 = vadd.f32 %v1015_v2, %v953_v56 }
 0x347   : > { %v955_v3 = vpop.f32.mrf.mxu1 }
 0x348   : > { %v1018_v14 = vadd.f32 %v1017_v6, %v955_v3 }
 0x34d   : > { %v1101_v5 = vpop.f32.mrf.mxu3 }
 0x34e   : > { %v1106_v9 = vadd.f32 %v1101_v5, %v1016_v8 }
 0x34f   : > { %v1322_v7 = vpop.f32.mrf.mxu1 }
 0x350   : > { %v1206_v11 = vadd.f32 %v1201_v4, %v1106_v9 }
 0x352   : > { %v1327_v15 = vadd.f32 %v1322_v7, %v1206_v11 }
 0x355   : > { %v1103_v44 = vpop.f32.mrf.mxu3  ;;  %v1409_v12 = vpop.f32.mrf.mxu2 }
 0x356   : > { %v1107_v16 = vadd.f32 %v1103_v44, %v1018_v14  ;;  %v1414_v17 = vadd.f32 %v1409_v12, %v1327_v15 }
 0x357   : > { %v1324_v13 = vpop.f32.mrf.mxu1  ;;  %v1606_v18 = vpop.f32.mrf.mxu0 }
 0x358   : > { %v1207_v20 = vadd.f32 %v1203_v10, %v1107_v16 }
 0x35a   : > { %v1328_v26 = vadd.f32 %v1324_v13, %v1207_v20 }
 0x35d   : > { %v1501_v19 = vpop.f32.mrf.mxu3  ;;  %v1411_v25 = vpop.f32.mrf.mxu2 }
 0x35e   : > { %v1506_v21 = vadd.f32 %v1501_v19, %v1414_v17  ;;  %v1415_v28 = vadd.f32 %v1411_v25, %v1328_v26 }
 0x35f   : > { %v1693_v22 = vpop.f32.mrf.mxu1  ;;  %v1608_v33 = vpop.f32.mrf.mxu0 }
 0x360   : > { %v1611_v23 = vadd.f32 %v1606_v18, %v1506_v21 }
 0x362   : > { %v1698_v27 = vadd.f32 %v1693_v22, %v1611_v23 }
 0x364   : > { %v1704_v29 = vadd.f32 %v2473_v24, %v1698_v27 }
 0x365   : > { %v1503_v30 = vpop.f32.mrf.mxu3 }
 0x366   : > { %v1706_v31 = vmax.f32 %v1704_v29, 0.0  ;;  %v1507_v32 = vadd.f32 %v1503_v30, %v1415_v28 }
 0x367   : > { %v1695_v35 = vpop.f32.mrf.mxu1 }
 0x368   : > { %1708 = vst [vmem:[%s277_s26] sm:$0xff] %v1706_v31  ;;  %v1612_v34 = vadd.f32 %v1608_v33, %v1507_v32 }
 0x36a   : > { %v1699_v36 = vadd.f32 %v1695_v35, %v1612_v34 }
 0x36c   : > { %v1705_v37 = vadd.f32 %v2473_v24, %v1699_v36 }
 0x36e   : > { %v1707_v38 = vmax.f32 %v1705_v37, 0.0 }
 0x370   : > { %1709 = vst [vmem:[%s277_s26 + $0x8] sm:$0xff] %v1707_v38 }
 0x371   : > { %2591 = shalt.err (!%p2588_p10)
}
 0x372   : > { %s2646_s8 = smov 128  }
 0x373   : > { %2401 = dma.vmem_to_hbm [thread:$0]  (%p2749_p3), %s1724_s24, 256, %s1726_s29, %s1711_s22, %s2646_s8, %s2646_s8, %s2644_s13  }
 0x374 PF: > { %s1740_s7 = sand.u32 1, %s2622_s18   ;;  %p2928_p12 = scmp.ge.s32.totalorder %s2634_s21, 2 }
 0x375   : > { %s1741_s26 = scalar_lea.sflag [#allocation6], %s1740_s7 }
 0x376   : > { %p2415_p13 = pnand %p2928_p12, %p2712_p6 }
 0x378   : > { %p2416_p0 = pneg %p2415_p13 }
 0x37a   : > { %2617 = dma.done.wait (%p2416_p0), %s1741_s26, 256  }
 0x37b   : > { %2619 = vsyncadd (%p2416_p0), %s1741_s26, 4294967040  ;;  %p19_p5 = scmp.ge.s32.totalorder %s2739_s14, 4   ;;  %s2929_s18 = smov %s2626_s19 }
 0x37c   : > { %s2930_s19 = smov %s2630_s20  ;;  %s2931_s20 = smov %s2755_s23 }
 0x37d   : > { %s2932_s21 = smov %s2739_s14  ;;  %21 = sbr.rel (!%p19_p5) target bundleno = 6 (0x6), region = 110 }
 0x382   :  { %1747 = vsyncpa [#allocation5], 1 }
 0x383   :  { %1749 = vsyncpa [#allocation5 + $0x1], 1 }
 0x384   :  { %1750 = vsyncpa [#allocation8], 1 }
 0x385   :  { %1751 = vsyncpa [#allocation6], 1 }
 0x386   :  { %1753 = vsyncpa [#allocation6 + $0x1], 1 }

</bundles_post_ra>
